<compile_context>
chip_gen: v5e
topology: v5e:2x2
jax: 0.10.0
libtpu: 0.0.40
codegen_flags: <defaults>
</compile_context>

<pallas_src>
import functools

import jax
import jax.numpy as jnp
from jax import lax
from jax.experimental import pallas as pl
from jax.experimental.pallas import tpu as pltpu


# ----------------------------------------------------------------------------
# Kernel
# ----------------------------------------------------------------------------
def fea_encoder_kernel(
    x_ref,        # (T*Bp, D)   bf16, time-major, batch padded to 8 sublanes
    wih0_ref,     # (D, 3H)     bf16  layer-0 input-hidden weights, gates [r|z|n]
    whh0_ref,     # (H, 3H)     bf16  layer-0 hidden-hidden weights
    bgi0_ref,     # (1, 3H)     f32   [bih_r+bhh_r | bih_z+bhh_z | bih_n]
    bhn0_ref,     # (1, H)      f32   bhh_n (stays inside r * (...))
    wih1_ref, whh1_ref, bgi1_ref, bhn1_ref,   # layer-1 equivalents
    fcw_ref,      # (3H, H)     f32   fc weight, rows stacked [max | mean | h_last]
    fcb_ref,      # (1, H)      f32
    out_ref,      # (Bp, 3H)    f32   [glob | h_final_l0 | h_final_l1]
    *, hidden_dim, seq_len, batch_padded,
):
    H, T, B = hidden_dim, seq_len, batch_padded
    f32, bf16 = jnp.float32, jnp.bfloat16

    whh0 = whh0_ref[...]
    whh1 = whh1_ref[...]
    wih1 = wih1_ref[...]
    # Hoisted bias broadcasts (JAX does not CSE broadcast_in_dim).
    bhn0 = jnp.broadcast_to(bhn0_ref[...], (B, H))
    bhn1 = jnp.broadcast_to(bhn1_ref[...], (B, H))
    bgi1 = jnp.broadcast_to(bgi1_ref[...], (B, 3 * H))

    def gru_gates(gi_t, gh_t, bhn, h):
        # Fused r/z sigmoid over the contiguous 2H lane slab (one EUP push).
        rz = jax.nn.sigmoid(gi_t[:, :2 * H] + gh_t[:, :2 * H])
        r = rz[:, :H]
        z = rz[:, H:]
        n = jnp.tanh(gi_t[:, 2 * H:] + r * (gh_t[:, 2 * H:] + bhn))
        return (1.0 - z) * n + z * h

    # Layer-0 input projection hoisted: one batched (T*Bp, D) @ (D, 3H) matmul.
    gi0 = jnp.dot(x_ref[...], wih0_ref[...],
                  preferred_element_type=f32) + bgi0_ref[...]

    h0 = jnp.zeros((B, H), f32)
    h1 = jnp.zeros((B, H), f32)
    h0b = h0.astype(bf16)
    h1b = h1.astype(bf16)
    h_max = None
    h_sum = None

    # Interleaved wavefront over both layers, fully unrolled (T=8).
    for t in range(T):
        # ---- layer 0, step t (only h0 @ Whh0 on the serial chain) ----
        gh0 = jnp.dot(h0b, whh0, preferred_element_type=f32)
        h0 = gru_gates(gi0[t * B:(t + 1) * B], gh0, bhn0, h0)
        h0b = h0.astype(bf16)

        # ---- layer 1, step t (depends only on h0_t and h1_{t-1}) ----
        gi1 = jnp.dot(h0b, wih1, preferred_element_type=f32) + bgi1
        gh1 = jnp.dot(h1b, whh1, preferred_element_type=f32)
        h1 = gru_gates(gi1, gh1, bhn1, h1)
        h1b = h1.astype(bf16)

        h_max = h1 if h_max is None else jnp.maximum(h_max, h1)
        h_sum = h1 if h_sum is None else h_sum + h1

    h_mean = h_sum * (1.0 / T)

    # glob = LeakyReLU(0.2)([h_max | h_mean | h_last] @ W_fc + b_fc), f32 matmul.
    feats = jnp.concatenate([h_max, h_mean, h1], axis=-1)            # (Bp, 3H)
    glob = jnp.dot(feats, fcw_ref[...],
                   preferred_element_type=f32) + fcb_ref[...]
    glob = jnp.where(glob >= 0.0, glob, 0.2 * glob)

    # Lane-dense single store: (Bp, 3H) = cat([glob, h_final_l0, h_final_l1]).
    out_ref[...] = jnp.concatenate([glob, h0, h1], axis=-1)


# ----------------------------------------------------------------------------
# Wrapper (weight packing + pallas_call)
# ----------------------------------------------------------------------------
def _pack_gru_layer(wih, whh, bih, bhh):
    """wih: (3,in,H), whh: (3,H,H), bih/bhh: (3,1,H) in gate order [r,z,n]."""
    wih_p = jnp.concatenate([wih[0], wih[1], wih[2]], axis=-1).astype(jnp.bfloat16)
    whh_p = jnp.concatenate([whh[0], whh[1], whh[2]], axis=-1).astype(jnp.bfloat16)
    # r/z biases fully combined; n keeps only bih_n (bhh_n applied inside r*()).
    bgi = jnp.concatenate([bih[0] + bhh[0], bih[1] + bhh[1], bih[2]], axis=-1)
    bhn = bhh[2]                                                      # (1, H)
    return wih_p, whh_p, bgi, bhn


def fea_encoder_forward(x, params, hidden_dim, layers=2):
    assert layers == 2, "kernel is written for layers=2"
    bs, T, D = x.shape
    H = hidden_dim
    SUB = 8
    bsp = max(SUB, ((bs + SUB - 1) // SUB) * SUB)   # pad batch to sublane tile

    # batch-first -> time-major, batch padded, flattened, bf16 MXU operand.
    x_p = jnp.pad(x.astype(jnp.float32), ((0, bsp - bs), (0, 0), (0, 0)))
    x_tm = jnp.transpose(x_p, (1, 0, 2)).reshape(T * bsp, D).astype(jnp.bfloat16)

    wih0, whh0, bgi0, bhn0 = _pack_gru_layer(
        params["wih0"], params["whh0"], params["bih0"], params["bhh0"])
    wih1, whh1, bgi1, bhn1 = _pack_gru_layer(
        params["wih1"], params["whh1"], params["bih1"], params["bhh1"])
    fcw = jnp.concatenate(
        [params["fcw"][0], params["fcw"][1], params["fcw"][2]], axis=0)  # (3H,H)
    fcb = params["fcb"]                                                  # (1,H)

    kernel = functools.partial(
        fea_encoder_kernel, hidden_dim=H, seq_len=T, batch_padded=bsp)

    vmem = pl.BlockSpec(memory_space=pltpu.MemorySpace.VMEM)
    args = (x_tm, wih0, whh0, bgi0, bhn0, wih1, whh1, bgi1, bhn1, fcw, fcb)

    out = pl.pallas_call(
        kernel,
        out_shape=jax.ShapeDtypeStruct((bsp, (layers + 1) * H), jnp.float32),
        in_specs=[vmem] * len(args),
        out_specs=vmem,
    )(*args)
    return out[:bs]                              # drop the sublane padding rows


# ----------------------------------------------------------------------------
# Pure-JAX reference (mirrors the PyTorch forward, eval mode, f32)
# ----------------------------------------------------------------------------
def _gru_cell_ref(xt, h, wih, whh, bih, bhh):
    gi_r = xt @ wih[0] + bih[0]
    gi_z = xt @ wih[1] + bih[1]
    gi_n = xt @ wih[2] + bih[2]
    gh_r = h @ whh[0] + bhh[0]
    gh_z = h @ whh[1] + bhh[1]
    gh_n = h @ whh[2] + bhh[2]
    r = jax.nn.sigmoid(gi_r + gh_r)
    z = jax.nn.sigmoid(gi_z + gh_z)
    n = jnp.tanh(gi_n + r * gh_n)
    return (1.0 - z) * n + z * h


def fea_encoder_ref(x, params, hidden_dim):
    bs, T, D = x.shape
    H = hidden_dim
    xs = jnp.transpose(x, (1, 0, 2)).astype(jnp.float32)

    def make_step(wih, whh, bih, bhh):
        def step(h, xt):
            hn = _gru_cell_ref(xt, h, wih, whh, bih, bhh)
            return hn, hn
        return step

    h0f, seq0 = lax.scan(
        make_step(params["wih0"], params["whh0"], params["bih0"], params["bhh0"]),
        jnp.zeros((bs, H), jnp.float32), xs)
    h1f, seq1 = lax.scan(
        make_step(params["wih1"], params["whh1"], params["bih1"], params["bhh1"]),
        jnp.zeros((bs, H), jnp.float32), seq0)

    out = jnp.transpose(seq1, (1, 0, 2))          # (bs, T, H)
    h1 = out.max(axis=1)
    h2 = out.mean(axis=1)
    fcw = params["fcw"]
    glob = h1 @ fcw[0] + h2 @ fcw[1] + h1f @ fcw[2] + params["fcb"]
    glob = jnp.where(glob >= 0.0, glob, 0.2 * glob)
    return jnp.concatenate([glob, h0f, h1f], axis=-1)


# ----------------------------------------------------------------------------
# Deterministic parameter init (PyTorch-style uniform(-1/sqrt(H), 1/sqrt(H)))
# ----------------------------------------------------------------------------
def init_params(key, input_dim, hidden_dim):
    H, D = hidden_dim, input_dim
    k_gru = 1.0 / jnp.sqrt(H)
    k_fc = 1.0 / jnp.sqrt(3.0 * H)
    keys = jax.random.split(key, 10)

    def u(k, shape, scale):
        return jax.random.uniform(k, shape, jnp.float32, -scale, scale)

    return {
        "wih0": u(keys[0], (3, D, H), k_gru),
        "whh0": u(keys[1], (3, H, H), k_gru),
        "bih0": u(keys[2], (3, 1, H), k_gru),
        "bhh0": u(keys[3], (3, 1, H), k_gru),
        "wih1": u(keys[4], (3, H, H), k_gru),
        "whh1": u(keys[5], (3, H, H), k_gru),
        "bih1": u(keys[6], (3, 1, H), k_gru),
        "bhh1": u(keys[7], (3, 1, H), k_gru),
        "fcw":  u(keys[8], (3, H, H), k_fc),
        "fcb":  u(keys[9], (1, H), k_fc),
    }


if __name__ == "__main__":
    bs, T, D, H, layers = 2, 8, 8, 32, 2

    key = jax.random.PRNGKey(0)
    k_x, k_p = jax.random.split(key)
    x = jax.random.normal(k_x, (bs, T, D), jnp.float32)
    params = init_params(k_p, D, H)

    out = fea_encoder_forward(x, params, H, layers=layers)
    out = jax.block_until_ready(out)

    ref = fea_encoder_ref(x, params, H)
    assert out.shape == (bs, (layers + 1) * H), out.shape
    max_err = float(jnp.max(jnp.abs(out - ref)))
    # bf16 MXU operands (f32 accumulation) -> expect ~1e-2 drift vs f32 reference.
    assert max_err < 5e-2, f"mismatch vs reference: {max_err}"

    print("KERNEL_OK")
</pallas_src>

<mosaic_0001>
module attributes {stable_mosaic.version = 11 : i64} {
  func.func @fea_encoder_kernel(%arg0: memref<64x8xbf16, #tpu.memory_space<vmem>>, %arg1: memref<8x96xbf16, #tpu.memory_space<vmem>>, %arg2: memref<32x96xbf16, #tpu.memory_space<vmem>>, %arg3: memref<1x96xf32, #tpu.memory_space<vmem>>, %arg4: memref<1x32xf32, #tpu.memory_space<vmem>>, %arg5: memref<32x96xbf16, #tpu.memory_space<vmem>>, %arg6: memref<32x96xbf16, #tpu.memory_space<vmem>>, %arg7: memref<1x96xf32, #tpu.memory_space<vmem>>, %arg8: memref<1x32xf32, #tpu.memory_space<vmem>>, %arg9: memref<96x32xf32, #tpu.memory_space<vmem>>, %arg10: memref<1x32xf32, #tpu.memory_space<vmem>>, %arg11: memref<8x96xf32, #tpu.memory_space<vmem>>) attributes {dimension_semantics = [], scalar_prefetch = 0 : i64, scratch_operands = 0 : i64, tpu.core_type = #tpu.core_type<tc>} {
    %c0 = arith.constant 0 : index
    %c0_0 = arith.constant 0 : index
    %0 = vector.load %arg2[%c0, %c0_0] : memref<32x96xbf16, #tpu.memory_space<vmem>>, vector<32x96xbf16>
    %c0_1 = arith.constant 0 : index
    %c0_2 = arith.constant 0 : index
    %1 = vector.load %arg6[%c0_1, %c0_2] : memref<32x96xbf16, #tpu.memory_space<vmem>>, vector<32x96xbf16>
    %c0_3 = arith.constant 0 : index
    %c0_4 = arith.constant 0 : index
    %2 = vector.load %arg5[%c0_3, %c0_4] : memref<32x96xbf16, #tpu.memory_space<vmem>>, vector<32x96xbf16>
    %c0_5 = arith.constant 0 : index
    %c0_6 = arith.constant 0 : index
    %3 = vector.load %arg4[%c0_5, %c0_6] : memref<1x32xf32, #tpu.memory_space<vmem>>, vector<1x32xf32>
    %4 = vector.shape_cast %3 : vector<1x32xf32> to vector<1x32xf32>
    %5 = vector.broadcast %4 : vector<1x32xf32> to vector<8x32xf32>
    %c0_7 = arith.constant 0 : index
    %c0_8 = arith.constant 0 : index
    %6 = vector.load %arg8[%c0_7, %c0_8] : memref<1x32xf32, #tpu.memory_space<vmem>>, vector<1x32xf32>
    %7 = vector.shape_cast %6 : vector<1x32xf32> to vector<1x32xf32>
    %8 = vector.broadcast %7 : vector<1x32xf32> to vector<8x32xf32>
    %c0_9 = arith.constant 0 : index
    %c0_10 = arith.constant 0 : index
    %9 = vector.load %arg7[%c0_9, %c0_10] : memref<1x96xf32, #tpu.memory_space<vmem>>, vector<1x96xf32>
    %10 = vector.shape_cast %9 : vector<1x96xf32> to vector<1x96xf32>
    %11 = vector.broadcast %10 : vector<1x96xf32> to vector<8x96xf32>
    %c0_11 = arith.constant 0 : index
    %c0_12 = arith.constant 0 : index
    %12 = vector.load %arg0[%c0_11, %c0_12] : memref<64x8xbf16, #tpu.memory_space<vmem>>, vector<64x8xbf16>
    %c0_13 = arith.constant 0 : index
    %c0_14 = arith.constant 0 : index
    %13 = vector.load %arg1[%c0_13, %c0_14] : memref<8x96xbf16, #tpu.memory_space<vmem>>, vector<8x96xbf16>
    %cst = arith.constant dense<0.000000e+00> : vector<64x96xf32>
    %14 = tpu.matmul %12, %13, %cst {dimension_numbers = #tpu.dot_dimension_numbers<[1], [0], [0], [1], [0, 0, 1, 1], [], []>} : vector<64x8xbf16>, vector<8x96xbf16>, vector<64x96xf32> -> vector<64x96xf32>
    %c0_15 = arith.constant 0 : index
    %c0_16 = arith.constant 0 : index
    %15 = vector.load %arg3[%c0_15, %c0_16] : memref<1x96xf32, #tpu.memory_space<vmem>>, vector<1x96xf32>
    %16 = vector.broadcast %15 : vector<1x96xf32> to vector<64x96xf32>
    %17 = arith.addf %14, %16 : vector<64x96xf32>
    %cst_17 = arith.constant 0.000000e+00 : f32
    %18 = vector.broadcast %cst_17 : f32 to vector<8x32xf32>
    %cst_18 = arith.constant 0.000000e+00 : f32
    %19 = vector.broadcast %cst_18 : f32 to vector<8x32xf32>
    %20 = arith.truncf %18 : vector<8x32xf32> to vector<8x32xbf16>
    %21 = arith.truncf %19 : vector<8x32xf32> to vector<8x32xbf16>
    %cst_19 = arith.constant dense<0.000000e+00> : vector<8x96xf32>
    %22 = tpu.matmul %20, %0, %cst_19 {dimension_numbers = #tpu.dot_dimension_numbers<[1], [0], [0], [1], [0, 0, 1, 1], [], []>} : vector<8x32xbf16>, vector<32x96xbf16>, vector<8x96xf32> -> vector<8x96xf32>
    %23 = vector.extract_strided_slice %17 {offsets = [0, 0], sizes = [8, 96], strides = [1, 1]} : vector<64x96xf32> to vector<8x96xf32>
    %24 = vector.extract_strided_slice %23 {offsets = [0, 0], sizes = [8, 64], strides = [1, 1]} : vector<8x96xf32> to vector<8x64xf32>
    %25 = vector.extract_strided_slice %22 {offsets = [0, 0], sizes = [8, 64], strides = [1, 1]} : vector<8x96xf32> to vector<8x64xf32>
    %26 = arith.addf %24, %25 : vector<8x64xf32>
    %27 = arith.negf %26 : vector<8x64xf32>
    %28 = math.exp %27 : vector<8x64xf32>
    %cst_20 = arith.constant 1.000000e+00 : f32
    %29 = vector.broadcast %cst_20 : f32 to vector<8x64xf32>
    %30 = arith.addf %29, %28 : vector<8x64xf32>
    %31 = arith.divf %29, %30 : vector<8x64xf32>
    %32 = vector.extract_strided_slice %31 {offsets = [0, 0], sizes = [8, 32], strides = [1, 1]} : vector<8x64xf32> to vector<8x32xf32>
    %33 = vector.extract_strided_slice %31 {offsets = [0, 32], sizes = [8, 32], strides = [1, 1]} : vector<8x64xf32> to vector<8x32xf32>
    %34 = vector.extract_strided_slice %23 {offsets = [0, 64], sizes = [8, 32], strides = [1, 1]} : vector<8x96xf32> to vector<8x32xf32>
    %35 = vector.extract_strided_slice %22 {offsets = [0, 64], sizes = [8, 32], strides = [1, 1]} : vector<8x96xf32> to vector<8x32xf32>
    %36 = arith.addf %35, %5 : vector<8x32xf32>
    %37 = arith.mulf %32, %36 : vector<8x32xf32>
    %38 = arith.addf %34, %37 : vector<8x32xf32>
    %39 = math.tanh %38 : vector<8x32xf32>
    %cst_21 = arith.constant 1.000000e+00 : f32
    %40 = vector.broadcast %cst_21 : f32 to vector<8x32xf32>
    %41 = arith.subf %40, %33 : vector<8x32xf32>
    %42 = arith.mulf %41, %39 : vector<8x32xf32>
    %43 = arith.mulf %33, %18 : vector<8x32xf32>
    %44 = arith.addf %42, %43 : vector<8x32xf32>
    %45 = arith.truncf %44 : vector<8x32xf32> to vector<8x32xbf16>
    %cst_22 = arith.constant dense<0.000000e+00> : vector<8x96xf32>
    %46 = tpu.matmul %45, %2, %cst_22 {dimension_numbers = #tpu.dot_dimension_numbers<[1], [0], [0], [1], [0, 0, 1, 1], [], []>} : vector<8x32xbf16>, vector<32x96xbf16>, vector<8x96xf32> -> vector<8x96xf32>
    %47 = arith.addf %46, %11 : vector<8x96xf32>
    %cst_23 = arith.constant dense<0.000000e+00> : vector<8x96xf32>
    %48 = tpu.matmul %21, %1, %cst_23 {dimension_numbers = #tpu.dot_dimension_numbers<[1], [0], [0], [1], [0, 0, 1, 1], [], []>} : vector<8x32xbf16>, vector<32x96xbf16>, vector<8x96xf32> -> vector<8x96xf32>
    %49 = vector.extract_strided_slice %47 {offsets = [0, 0], sizes = [8, 64], strides = [1, 1]} : vector<8x96xf32> to vector<8x64xf32>
    %50 = vector.extract_strided_slice %48 {offsets = [0, 0], sizes = [8, 64], strides = [1, 1]} : vector<8x96xf32> to vector<8x64xf32>
    %51 = arith.addf %49, %50 : vector<8x64xf32>
    %52 = arith.negf %51 : vector<8x64xf32>
    %53 = math.exp %52 : vector<8x64xf32>
    %cst_24 = arith.constant 1.000000e+00 : f32
    %54 = vector.broadcast %cst_24 : f32 to vector<8x64xf32>
    %55 = arith.addf %54, %53 : vector<8x64xf32>
    %56 = arith.divf %54, %55 : vector<8x64xf32>
    %57 = vector.extract_strided_slice %56 {offsets = [0, 0], sizes = [8, 32], strides = [1, 1]} : vector<8x64xf32> to vector<8x32xf32>
    %58 = vector.extract_strided_slice %56 {offsets = [0, 32], sizes = [8, 32], strides = [1, 1]} : vector<8x64xf32> to vector<8x32xf32>
    %59 = vector.extract_strided_slice %47 {offsets = [0, 64], sizes = [8, 32], strides = [1, 1]} : vector<8x96xf32> to vector<8x32xf32>
    %60 = vector.extract_strided_slice %48 {offsets = [0, 64], sizes = [8, 32], strides = [1, 1]} : vector<8x96xf32> to vector<8x32xf32>
    %61 = arith.addf %60, %8 : vector<8x32xf32>
    %62 = arith.mulf %57, %61 : vector<8x32xf32>
    %63 = arith.addf %59, %62 : vector<8x32xf32>
    %64 = math.tanh %63 : vector<8x32xf32>
    %cst_25 = arith.constant 1.000000e+00 : f32
    %65 = vector.broadcast %cst_25 : f32 to vector<8x32xf32>
    %66 = arith.subf %65, %58 : vector<8x32xf32>
    %67 = arith.mulf %66, %64 : vector<8x32xf32>
    %68 = arith.mulf %58, %19 : vector<8x32xf32>
    %69 = arith.addf %67, %68 : vector<8x32xf32>
    %70 = arith.truncf %69 : vector<8x32xf32> to vector<8x32xbf16>
    %cst_26 = arith.constant dense<0.000000e+00> : vector<8x96xf32>
    %71 = tpu.matmul %45, %0, %cst_26 {dimension_numbers = #tpu.dot_dimension_numbers<[1], [0], [0], [1], [0, 0, 1, 1], [], []>} : vector<8x32xbf16>, vector<32x96xbf16>, vector<8x96xf32> -> vector<8x96xf32>
    %72 = vector.extract_strided_slice %17 {offsets = [8, 0], sizes = [8, 96], strides = [1, 1]} : vector<64x96xf32> to vector<8x96xf32>
    %73 = vector.extract_strided_slice %72 {offsets = [0, 0], sizes = [8, 64], strides = [1, 1]} : vector<8x96xf32> to vector<8x64xf32>
    %74 = vector.extract_strided_slice %71 {offsets = [0, 0], sizes = [8, 64], strides = [1, 1]} : vector<8x96xf32> to vector<8x64xf32>
    %75 = arith.addf %73, %74 : vector<8x64xf32>
    %76 = arith.negf %75 : vector<8x64xf32>
    %77 = math.exp %76 : vector<8x64xf32>
    %cst_27 = arith.constant 1.000000e+00 : f32
    %78 = vector.broadcast %cst_27 : f32 to vector<8x64xf32>
    %79 = arith.addf %78, %77 : vector<8x64xf32>
    %80 = arith.divf %78, %79 : vector<8x64xf32>
    %81 = vector.extract_strided_slice %80 {offsets = [0, 0], sizes = [8, 32], strides = [1, 1]} : vector<8x64xf32> to vector<8x32xf32>
    %82 = vector.extract_strided_slice %80 {offsets = [0, 32], sizes = [8, 32], strides = [1, 1]} : vector<8x64xf32> to vector<8x32xf32>
    %83 = vector.extract_strided_slice %72 {offsets = [0, 64], sizes = [8, 32], strides = [1, 1]} : vector<8x96xf32> to vector<8x32xf32>
    %84 = vector.extract_strided_slice %71 {offsets = [0, 64], sizes = [8, 32], strides = [1, 1]} : vector<8x96xf32> to vector<8x32xf32>
    %85 = arith.addf %84, %5 : vector<8x32xf32>
    %86 = arith.mulf %81, %85 : vector<8x32xf32>
    %87 = arith.addf %83, %86 : vector<8x32xf32>
    %88 = math.tanh %87 : vector<8x32xf32>
    %cst_28 = arith.constant 1.000000e+00 : f32
    %89 = vector.broadcast %cst_28 : f32 to vector<8x32xf32>
    %90 = arith.subf %89, %82 : vector<8x32xf32>
    %91 = arith.mulf %90, %88 : vector<8x32xf32>
    %92 = arith.mulf %82, %44 : vector<8x32xf32>
    %93 = arith.addf %91, %92 : vector<8x32xf32>
    %94 = arith.truncf %93 : vector<8x32xf32> to vector<8x32xbf16>
    %cst_29 = arith.constant dense<0.000000e+00> : vector<8x96xf32>
    %95 = tpu.matmul %94, %2, %cst_29 {dimension_numbers = #tpu.dot_dimension_numbers<[1], [0], [0], [1], [0, 0, 1, 1], [], []>} : vector<8x32xbf16>, vector<32x96xbf16>, vector<8x96xf32> -> vector<8x96xf32>
    %96 = arith.addf %95, %11 : vector<8x96xf32>
    %cst_30 = arith.constant dense<0.000000e+00> : vector<8x96xf32>
    %97 = tpu.matmul %70, %1, %cst_30 {dimension_numbers = #tpu.dot_dimension_numbers<[1], [0], [0], [1], [0, 0, 1, 1], [], []>} : vector<8x32xbf16>, vector<32x96xbf16>, vector<8x96xf32> -> vector<8x96xf32>
    %98 = vector.extract_strided_slice %96 {offsets = [0, 0], sizes = [8, 64], strides = [1, 1]} : vector<8x96xf32> to vector<8x64xf32>
    %99 = vector.extract_strided_slice %97 {offsets = [0, 0], sizes = [8, 64], strides = [1, 1]} : vector<8x96xf32> to vector<8x64xf32>
    %100 = arith.addf %98, %99 : vector<8x64xf32>
    %101 = arith.negf %100 : vector<8x64xf32>
    %102 = math.exp %101 : vector<8x64xf32>
    %cst_31 = arith.constant 1.000000e+00 : f32
    %103 = vector.broadcast %cst_31 : f32 to vector<8x64xf32>
    %104 = arith.addf %103, %102 : vector<8x64xf32>
    %105 = arith.divf %103, %104 : vector<8x64xf32>
    %106 = vector.extract_strided_slice %105 {offsets = [0, 0], sizes = [8, 32], strides = [1, 1]} : vector<8x64xf32> to vector<8x32xf32>
    %107 = vector.extract_strided_slice %105 {offsets = [0, 32], sizes = [8, 32], strides = [1, 1]} : vector<8x64xf32> to vector<8x32xf32>
    %108 = vector.extract_strided_slice %96 {offsets = [0, 64], sizes = [8, 32], strides = [1, 1]} : vector<8x96xf32> to vector<8x32xf32>
    %109 = vector.extract_strided_slice %97 {offsets = [0, 64], sizes = [8, 32], strides = [1, 1]} : vector<8x96xf32> to vector<8x32xf32>
    %110 = arith.addf %109, %8 : vector<8x32xf32>
    %111 = arith.mulf %106, %110 : vector<8x32xf32>
    %112 = arith.addf %108, %111 : vector<8x32xf32>
    %113 = math.tanh %112 : vector<8x32xf32>
    %cst_32 = arith.constant 1.000000e+00 : f32
    %114 = vector.broadcast %cst_32 : f32 to vector<8x32xf32>
    %115 = arith.subf %114, %107 : vector<8x32xf32>
    %116 = arith.mulf %115, %113 : vector<8x32xf32>
    %117 = arith.mulf %107, %69 : vector<8x32xf32>
    %118 = arith.addf %116, %117 : vector<8x32xf32>
    %119 = arith.truncf %118 : vector<8x32xf32> to vector<8x32xbf16>
    %120 = arith.maximumf %69, %118 : vector<8x32xf32>
    %121 = arith.addf %69, %118 : vector<8x32xf32>
    %cst_33 = arith.constant dense<0.000000e+00> : vector<8x96xf32>
    %122 = tpu.matmul %94, %0, %cst_33 {dimension_numbers = #tpu.dot_dimension_numbers<[1], [0], [0], [1], [0, 0, 1, 1], [], []>} : vector<8x32xbf16>, vector<32x96xbf16>, vector<8x96xf32> -> vector<8x96xf32>
    %123 = vector.extract_strided_slice %17 {offsets = [16, 0], sizes = [8, 96], strides = [1, 1]} : vector<64x96xf32> to vector<8x96xf32>
    %124 = vector.extract_strided_slice %123 {offsets = [0, 0], sizes = [8, 64], strides = [1, 1]} : vector<8x96xf32> to vector<8x64xf32>
    %125 = vector.extract_strided_slice %122 {offsets = [0, 0], sizes = [8, 64], strides = [1, 1]} : vector<8x96xf32> to vector<8x64xf32>
    %126 = arith.addf %124, %125 : vector<8x64xf32>
    %127 = arith.negf %126 : vector<8x64xf32>
    %128 = math.exp %127 : vector<8x64xf32>
    %cst_34 = arith.constant 1.000000e+00 : f32
    %129 = vector.broadcast %cst_34 : f32 to vector<8x64xf32>
    %130 = arith.addf %129, %128 : vector<8x64xf32>
    %131 = arith.divf %129, %130 : vector<8x64xf32>
    %132 = vector.extract_strided_slice %131 {offsets = [0, 0], sizes = [8, 32], strides = [1, 1]} : vector<8x64xf32> to vector<8x32xf32>
    %133 = vector.extract_strided_slice %131 {offsets = [0, 32], sizes = [8, 32], strides = [1, 1]} : vector<8x64xf32> to vector<8x32xf32>
    %134 = vector.extract_strided_slice %123 {offsets = [0, 64], sizes = [8, 32], strides = [1, 1]} : vector<8x96xf32> to vector<8x32xf32>
    %135 = vector.extract_strided_slice %122 {offsets = [0, 64], sizes = [8, 32], strides = [1, 1]} : vector<8x96xf32> to vector<8x32xf32>
    %136 = arith.addf %135, %5 : vector<8x32xf32>
    %137 = arith.mulf %132, %136 : vector<8x32xf32>
    %138 = arith.addf %134, %137 : vector<8x32xf32>
    %139 = math.tanh %138 : vector<8x32xf32>
    %cst_35 = arith.constant 1.000000e+00 : f32
    %140 = vector.broadcast %cst_35 : f32 to vector<8x32xf32>
    %141 = arith.subf %140, %133 : vector<8x32xf32>
    %142 = arith.mulf %141, %139 : vector<8x32xf32>
    %143 = arith.mulf %133, %93 : vector<8x32xf32>
    %144 = arith.addf %142, %143 : vector<8x32xf32>
    %145 = arith.truncf %144 : vector<8x32xf32> to vector<8x32xbf16>
    %cst_36 = arith.constant dense<0.000000e+00> : vector<8x96xf32>
    %146 = tpu.matmul %145, %2, %cst_36 {dimension_numbers = #tpu.dot_dimension_numbers<[1], [0], [0], [1], [0, 0, 1, 1], [], []>} : vector<8x32xbf16>, vector<32x96xbf16>, vector<8x96xf32> -> vector<8x96xf32>
    %147 = arith.addf %146, %11 : vector<8x96xf32>
    %cst_37 = arith.constant dense<0.000000e+00> : vector<8x96xf32>
    %148 = tpu.matmul %119, %1, %cst_37 {dimension_numbers = #tpu.dot_dimension_numbers<[1], [0], [0], [1], [0, 0, 1, 1], [], []>} : vector<8x32xbf16>, vector<32x96xbf16>, vector<8x96xf32> -> vector<8x96xf32>
    %149 = vector.extract_strided_slice %147 {offsets = [0, 0], sizes = [8, 64], strides = [1, 1]} : vector<8x96xf32> to vector<8x64xf32>
    %150 = vector.extract_strided_slice %148 {offsets = [0, 0], sizes = [8, 64], strides = [1, 1]} : vector<8x96xf32> to vector<8x64xf32>
    %151 = arith.addf %149, %150 : vector<8x64xf32>
    %152 = arith.negf %151 : vector<8x64xf32>
    %153 = math.exp %152 : vector<8x64xf32>
    %cst_38 = arith.constant 1.000000e+00 : f32
    %154 = vector.broadcast %cst_38 : f32 to vector<8x64xf32>
    %155 = arith.addf %154, %153 : vector<8x64xf32>
    %156 = arith.divf %154, %155 : vector<8x64xf32>
    %157 = vector.extract_strided_slice %156 {offsets = [0, 0], sizes = [8, 32], strides = [1, 1]} : vector<8x64xf32> to vector<8x32xf32>
    %158 = vector.extract_strided_slice %156 {offsets = [0, 32], sizes = [8, 32], strides = [1, 1]} : vector<8x64xf32> to vector<8x32xf32>
    %159 = vector.extract_strided_slice %147 {offsets = [0, 64], sizes = [8, 32], strides = [1, 1]} : vector<8x96xf32> to vector<8x32xf32>
    %160 = vector.extract_strided_slice %148 {offsets = [0, 64], sizes = [8, 32], strides = [1, 1]} : vector<8x96xf32> to vector<8x32xf32>
    %161 = arith.addf %160, %8 : vector<8x32xf32>
    %162 = arith.mulf %157, %161 : vector<8x32xf32>
    %163 = arith.addf %159, %162 : vector<8x32xf32>
    %164 = math.tanh %163 : vector<8x32xf32>
    %cst_39 = arith.constant 1.000000e+00 : f32
    %165 = vector.broadcast %cst_39 : f32 to vector<8x32xf32>
    %166 = arith.subf %165, %158 : vector<8x32xf32>
    %167 = arith.mulf %166, %164 : vector<8x32xf32>
    %168 = arith.mulf %158, %118 : vector<8x32xf32>
    %169 = arith.addf %167, %168 : vector<8x32xf32>
    %170 = arith.truncf %169 : vector<8x32xf32> to vector<8x32xbf16>
    %171 = arith.maximumf %120, %169 : vector<8x32xf32>
    %172 = arith.addf %121, %169 : vector<8x32xf32>
    %cst_40 = arith.constant dense<0.000000e+00> : vector<8x96xf32>
    %173 = tpu.matmul %145, %0, %cst_40 {dimension_numbers = #tpu.dot_dimension_numbers<[1], [0], [0], [1], [0, 0, 1, 1], [], []>} : vector<8x32xbf16>, vector<32x96xbf16>, vector<8x96xf32> -> vector<8x96xf32>
    %174 = vector.extract_strided_slice %17 {offsets = [24, 0], sizes = [8, 96], strides = [1, 1]} : vector<64x96xf32> to vector<8x96xf32>
    %175 = vector.extract_strided_slice %174 {offsets = [0, 0], sizes = [8, 64], strides = [1, 1]} : vector<8x96xf32> to vector<8x64xf32>
    %176 = vector.extract_strided_slice %173 {offsets = [0, 0], sizes = [8, 64], strides = [1, 1]} : vector<8x96xf32> to vector<8x64xf32>
    %177 = arith.addf %175, %176 : vector<8x64xf32>
    %178 = arith.negf %177 : vector<8x64xf32>
    %179 = math.exp %178 : vector<8x64xf32>
    %cst_41 = arith.constant 1.000000e+00 : f32
    %180 = vector.broadcast %cst_41 : f32 to vector<8x64xf32>
    %181 = arith.addf %180, %179 : vector<8x64xf32>
    %182 = arith.divf %180, %181 : vector<8x64xf32>
    %183 = vector.extract_strided_slice %182 {offsets = [0, 0], sizes = [8, 32], strides = [1, 1]} : vector<8x64xf32> to vector<8x32xf32>
    %184 = vector.extract_strided_slice %182 {offsets = [0, 32], sizes = [8, 32], strides = [1, 1]} : vector<8x64xf32> to vector<8x32xf32>
    %185 = vector.extract_strided_slice %174 {offsets = [0, 64], sizes = [8, 32], strides = [1, 1]} : vector<8x96xf32> to vector<8x32xf32>
    %186 = vector.extract_strided_slice %173 {offsets = [0, 64], sizes = [8, 32], strides = [1, 1]} : vector<8x96xf32> to vector<8x32xf32>
    %187 = arith.addf %186, %5 : vector<8x32xf32>
    %188 = arith.mulf %183, %187 : vector<8x32xf32>
    %189 = arith.addf %185, %188 : vector<8x32xf32>
    %190 = math.tanh %189 : vector<8x32xf32>
    %cst_42 = arith.constant 1.000000e+00 : f32
    %191 = vector.broadcast %cst_42 : f32 to vector<8x32xf32>
    %192 = arith.subf %191, %184 : vector<8x32xf32>
    %193 = arith.mulf %192, %190 : vector<8x32xf32>
    %194 = arith.mulf %184, %144 : vector<8x32xf32>
    %195 = arith.addf %193, %194 : vector<8x32xf32>
    %196 = arith.truncf %195 : vector<8x32xf32> to vector<8x32xbf16>
    %cst_43 = arith.constant dense<0.000000e+00> : vector<8x96xf32>
    %197 = tpu.matmul %196, %2, %cst_43 {dimension_numbers = #tpu.dot_dimension_numbers<[1], [0], [0], [1], [0, 0, 1, 1], [], []>} : vector<8x32xbf16>, vector<32x96xbf16>, vector<8x96xf32> -> vector<8x96xf32>
    %198 = arith.addf %197, %11 : vector<8x96xf32>
    %cst_44 = arith.constant dense<0.000000e+00> : vector<8x96xf32>
    %199 = tpu.matmul %170, %1, %cst_44 {dimension_numbers = #tpu.dot_dimension_numbers<[1], [0], [0], [1], [0, 0, 1, 1], [], []>} : vector<8x32xbf16>, vector<32x96xbf16>, vector<8x96xf32> -> vector<8x96xf32>
    %200 = vector.extract_strided_slice %198 {offsets = [0, 0], sizes = [8, 64], strides = [1, 1]} : vector<8x96xf32> to vector<8x64xf32>
    %201 = vector.extract_strided_slice %199 {offsets = [0, 0], sizes = [8, 64], strides = [1, 1]} : vector<8x96xf32> to vector<8x64xf32>
    %202 = arith.addf %200, %201 : vector<8x64xf32>
    %203 = arith.negf %202 : vector<8x64xf32>
    %204 = math.exp %203 : vector<8x64xf32>
    %cst_45 = arith.constant 1.000000e+00 : f32
    %205 = vector.broadcast %cst_45 : f32 to vector<8x64xf32>
    %206 = arith.addf %205, %204 : vector<8x64xf32>
    %207 = arith.divf %205, %206 : vector<8x64xf32>
    %208 = vector.extract_strided_slice %207 {offsets = [0, 0], sizes = [8, 32], strides = [1, 1]} : vector<8x64xf32> to vector<8x32xf32>
    %209 = vector.extract_strided_slice %207 {offsets = [0, 32], sizes = [8, 32], strides = [1, 1]} : vector<8x64xf32> to vector<8x32xf32>
    %210 = vector.extract_strided_slice %198 {offsets = [0, 64], sizes = [8, 32], strides = [1, 1]} : vector<8x96xf32> to vector<8x32xf32>
    %211 = vector.extract_strided_slice %199 {offsets = [0, 64], sizes = [8, 32], strides = [1, 1]} : vector<8x96xf32> to vector<8x32xf32>
    %212 = arith.addf %211, %8 : vector<8x32xf32>
    %213 = arith.mulf %208, %212 : vector<8x32xf32>
    %214 = arith.addf %210, %213 : vector<8x32xf32>
    %215 = math.tanh %214 : vector<8x32xf32>
    %cst_46 = arith.constant 1.000000e+00 : f32
    %216 = vector.broadcast %cst_46 : f32 to vector<8x32xf32>
    %217 = arith.subf %216, %209 : vector<8x32xf32>
    %218 = arith.mulf %217, %215 : vector<8x32xf32>
    %219 = arith.mulf %209, %169 : vector<8x32xf32>
    %220 = arith.addf %218, %219 : vector<8x32xf32>
    %221 = arith.truncf %220 : vector<8x32xf32> to vector<8x32xbf16>
    %222 = arith.maximumf %171, %220 : vector<8x32xf32>
    %223 = arith.addf %172, %220 : vector<8x32xf32>
    %cst_47 = arith.constant dense<0.000000e+00> : vector<8x96xf32>
    %224 = tpu.matmul %196, %0, %cst_47 {dimension_numbers = #tpu.dot_dimension_numbers<[1], [0], [0], [1], [0, 0, 1, 1], [], []>} : vector<8x32xbf16>, vector<32x96xbf16>, vector<8x96xf32> -> vector<8x96xf32>
    %225 = vector.extract_strided_slice %17 {offsets = [32, 0], sizes = [8, 96], strides = [1, 1]} : vector<64x96xf32> to vector<8x96xf32>
    %226 = vector.extract_strided_slice %225 {offsets = [0, 0], sizes = [8, 64], strides = [1, 1]} : vector<8x96xf32> to vector<8x64xf32>
    %227 = vector.extract_strided_slice %224 {offsets = [0, 0], sizes = [8, 64], strides = [1, 1]} : vector<8x96xf32> to vector<8x64xf32>
    %228 = arith.addf %226, %227 : vector<8x64xf32>
    %229 = arith.negf %228 : vector<8x64xf32>
    %230 = math.exp %229 : vector<8x64xf32>
    %cst_48 = arith.constant 1.000000e+00 : f32
    %231 = vector.broadcast %cst_48 : f32 to vector<8x64xf32>
    %232 = arith.addf %231, %230 : vector<8x64xf32>
    %233 = arith.divf %231, %232 : vector<8x64xf32>
    %234 = vector.extract_strided_slice %233 {offsets = [0, 0], sizes = [8, 32], strides = [1, 1]} : vector<8x64xf32> to vector<8x32xf32>
    %235 = vector.extract_strided_slice %233 {offsets = [0, 32], sizes = [8, 32], strides = [1, 1]} : vector<8x64xf32> to vector<8x32xf32>
    %236 = vector.extract_strided_slice %225 {offsets = [0, 64], sizes = [8, 32], strides = [1, 1]} : vector<8x96xf32> to vector<8x32xf32>
    %237 = vector.extract_strided_slice %224 {offsets = [0, 64], sizes = [8, 32], strides = [1, 1]} : vector<8x96xf32> to vector<8x32xf32>
    %238 = arith.addf %237, %5 : vector<8x32xf32>
    %239 = arith.mulf %234, %238 : vector<8x32xf32>
    %240 = arith.addf %236, %239 : vector<8x32xf32>
    %241 = math.tanh %240 : vector<8x32xf32>
    %cst_49 = arith.constant 1.000000e+00 : f32
    %242 = vector.broadcast %cst_49 : f32 to vector<8x32xf32>
    %243 = arith.subf %242, %235 : vector<8x32xf32>
    %244 = arith.mulf %243, %241 : vector<8x32xf32>
    %245 = arith.mulf %235, %195 : vector<8x32xf32>
    %246 = arith.addf %244, %245 : vector<8x32xf32>
    %247 = arith.truncf %246 : vector<8x32xf32> to vector<8x32xbf16>
    %cst_50 = arith.constant dense<0.000000e+00> : vector<8x96xf32>
    %248 = tpu.matmul %247, %2, %cst_50 {dimension_numbers = #tpu.dot_dimension_numbers<[1], [0], [0], [1], [0, 0, 1, 1], [], []>} : vector<8x32xbf16>, vector<32x96xbf16>, vector<8x96xf32> -> vector<8x96xf32>
    %249 = arith.addf %248, %11 : vector<8x96xf32>
    %cst_51 = arith.constant dense<0.000000e+00> : vector<8x96xf32>
    %250 = tpu.matmul %221, %1, %cst_51 {dimension_numbers = #tpu.dot_dimension_numbers<[1], [0], [0], [1], [0, 0, 1, 1], [], []>} : vector<8x32xbf16>, vector<32x96xbf16>, vector<8x96xf32> -> vector<8x96xf32>
    %251 = vector.extract_strided_slice %249 {offsets = [0, 0], sizes = [8, 64], strides = [1, 1]} : vector<8x96xf32> to vector<8x64xf32>
    %252 = vector.extract_strided_slice %250 {offsets = [0, 0], sizes = [8, 64], strides = [1, 1]} : vector<8x96xf32> to vector<8x64xf32>
    %253 = arith.addf %251, %252 : vector<8x64xf32>
    %254 = arith.negf %253 : vector<8x64xf32>
    %255 = math.exp %254 : vector<8x64xf32>
    %cst_52 = arith.constant 1.000000e+00 : f32
    %256 = vector.broadcast %cst_52 : f32 to vector<8x64xf32>
    %257 = arith.addf %256, %255 : vector<8x64xf32>
    %258 = arith.divf %256, %257 : vector<8x64xf32>
    %259 = vector.extract_strided_slice %258 {offsets = [0, 0], sizes = [8, 32], strides = [1, 1]} : vector<8x64xf32> to vector<8x32xf32>
    %260 = vector.extract_strided_slice %258 {offsets = [0, 32], sizes = [8, 32], strides = [1, 1]} : vector<8x64xf32> to vector<8x32xf32>
    %261 = vector.extract_strided_slice %249 {offsets = [0, 64], sizes = [8, 32], strides = [1, 1]} : vector<8x96xf32> to vector<8x32xf32>
    %262 = vector.extract_strided_slice %250 {offsets = [0, 64], sizes = [8, 32], strides = [1, 1]} : vector<8x96xf32> to vector<8x32xf32>
    %263 = arith.addf %262, %8 : vector<8x32xf32>
    %264 = arith.mulf %259, %263 : vector<8x32xf32>
    %265 = arith.addf %261, %264 : vector<8x32xf32>
    %266 = math.tanh %265 : vector<8x32xf32>
    %cst_53 = arith.constant 1.000000e+00 : f32
    %267 = vector.broadcast %cst_53 : f32 to vector<8x32xf32>
    %268 = arith.subf %267, %260 : vector<8x32xf32>
    %269 = arith.mulf %268, %266 : vector<8x32xf32>
    %270 = arith.mulf %260, %220 : vector<8x32xf32>
    %271 = arith.addf %269, %270 : vector<8x32xf32>
    %272 = arith.truncf %271 : vector<8x32xf32> to vector<8x32xbf16>
    %273 = arith.maximumf %222, %271 : vector<8x32xf32>
    %274 = arith.addf %223, %271 : vector<8x32xf32>
    %cst_54 = arith.constant dense<0.000000e+00> : vector<8x96xf32>
    %275 = tpu.matmul %247, %0, %cst_54 {dimension_numbers = #tpu.dot_dimension_numbers<[1], [0], [0], [1], [0, 0, 1, 1], [], []>} : vector<8x32xbf16>, vector<32x96xbf16>, vector<8x96xf32> -> vector<8x96xf32>
    %276 = vector.extract_strided_slice %17 {offsets = [40, 0], sizes = [8, 96], strides = [1, 1]} : vector<64x96xf32> to vector<8x96xf32>
    %277 = vector.extract_strided_slice %276 {offsets = [0, 0], sizes = [8, 64], strides = [1, 1]} : vector<8x96xf32> to vector<8x64xf32>
    %278 = vector.extract_strided_slice %275 {offsets = [0, 0], sizes = [8, 64], strides = [1, 1]} : vector<8x96xf32> to vector<8x64xf32>
    %279 = arith.addf %277, %278 : vector<8x64xf32>
    %280 = arith.negf %279 : vector<8x64xf32>
    %281 = math.exp %280 : vector<8x64xf32>
    %cst_55 = arith.constant 1.000000e+00 : f32
    %282 = vector.broadcast %cst_55 : f32 to vector<8x64xf32>
    %283 = arith.addf %282, %281 : vector<8x64xf32>
    %284 = arith.divf %282, %283 : vector<8x64xf32>
    %285 = vector.extract_strided_slice %284 {offsets = [0, 0], sizes = [8, 32], strides = [1, 1]} : vector<8x64xf32> to vector<8x32xf32>
    %286 = vector.extract_strided_slice %284 {offsets = [0, 32], sizes = [8, 32], strides = [1, 1]} : vector<8x64xf32> to vector<8x32xf32>
    %287 = vector.extract_strided_slice %276 {offsets = [0, 64], sizes = [8, 32], strides = [1, 1]} : vector<8x96xf32> to vector<8x32xf32>
    %288 = vector.extract_strided_slice %275 {offsets = [0, 64], sizes = [8, 32], strides = [1, 1]} : vector<8x96xf32> to vector<8x32xf32>
    %289 = arith.addf %288, %5 : vector<8x32xf32>
    %290 = arith.mulf %285, %289 : vector<8x32xf32>
    %291 = arith.addf %287, %290 : vector<8x32xf32>
    %292 = math.tanh %291 : vector<8x32xf32>
    %cst_56 = arith.constant 1.000000e+00 : f32
    %293 = vector.broadcast %cst_56 : f32 to vector<8x32xf32>
    %294 = arith.subf %293, %286 : vector<8x32xf32>
    %295 = arith.mulf %294, %292 : vector<8x32xf32>
    %296 = arith.mulf %286, %246 : vector<8x32xf32>
    %297 = arith.addf %295, %296 : vector<8x32xf32>
    %298 = arith.truncf %297 : vector<8x32xf32> to vector<8x32xbf16>
    %cst_57 = arith.constant dense<0.000000e+00> : vector<8x96xf32>
    %299 = tpu.matmul %298, %2, %cst_57 {dimension_numbers = #tpu.dot_dimension_numbers<[1], [0], [0], [1], [0, 0, 1, 1], [], []>} : vector<8x32xbf16>, vector<32x96xbf16>, vector<8x96xf32> -> vector<8x96xf32>
    %300 = arith.addf %299, %11 : vector<8x96xf32>
    %cst_58 = arith.constant dense<0.000000e+00> : vector<8x96xf32>
    %301 = tpu.matmul %272, %1, %cst_58 {dimension_numbers = #tpu.dot_dimension_numbers<[1], [0], [0], [1], [0, 0, 1, 1], [], []>} : vector<8x32xbf16>, vector<32x96xbf16>, vector<8x96xf32> -> vector<8x96xf32>
    %302 = vector.extract_strided_slice %300 {offsets = [0, 0], sizes = [8, 64], strides = [1, 1]} : vector<8x96xf32> to vector<8x64xf32>
    %303 = vector.extract_strided_slice %301 {offsets = [0, 0], sizes = [8, 64], strides = [1, 1]} : vector<8x96xf32> to vector<8x64xf32>
    %304 = arith.addf %302, %303 : vector<8x64xf32>
    %305 = arith.negf %304 : vector<8x64xf32>
    %306 = math.exp %305 : vector<8x64xf32>
    %cst_59 = arith.constant 1.000000e+00 : f32
    %307 = vector.broadcast %cst_59 : f32 to vector<8x64xf32>
    %308 = arith.addf %307, %306 : vector<8x64xf32>
    %309 = arith.divf %307, %308 : vector<8x64xf32>
    %310 = vector.extract_strided_slice %309 {offsets = [0, 0], sizes = [8, 32], strides = [1, 1]} : vector<8x64xf32> to vector<8x32xf32>
    %311 = vector.extract_strided_slice %309 {offsets = [0, 32], sizes = [8, 32], strides = [1, 1]} : vector<8x64xf32> to vector<8x32xf32>
    %312 = vector.extract_strided_slice %300 {offsets = [0, 64], sizes = [8, 32], strides = [1, 1]} : vector<8x96xf32> to vector<8x32xf32>
    %313 = vector.extract_strided_slice %301 {offsets = [0, 64], sizes = [8, 32], strides = [1, 1]} : vector<8x96xf32> to vector<8x32xf32>
    %314 = arith.addf %313, %8 : vector<8x32xf32>
    %315 = arith.mulf %310, %314 : vector<8x32xf32>
    %316 = arith.addf %312, %315 : vector<8x32xf32>
    %317 = math.tanh %316 : vector<8x32xf32>
    %cst_60 = arith.constant 1.000000e+00 : f32
    %318 = vector.broadcast %cst_60 : f32 to vector<8x32xf32>
    %319 = arith.subf %318, %311 : vector<8x32xf32>
    %320 = arith.mulf %319, %317 : vector<8x32xf32>
    %321 = arith.mulf %311, %271 : vector<8x32xf32>
    %322 = arith.addf %320, %321 : vector<8x32xf32>
    %323 = arith.truncf %322 : vector<8x32xf32> to vector<8x32xbf16>
    %324 = arith.maximumf %273, %322 : vector<8x32xf32>
    %325 = arith.addf %274, %322 : vector<8x32xf32>
    %cst_61 = arith.constant dense<0.000000e+00> : vector<8x96xf32>
    %326 = tpu.matmul %298, %0, %cst_61 {dimension_numbers = #tpu.dot_dimension_numbers<[1], [0], [0], [1], [0, 0, 1, 1], [], []>} : vector<8x32xbf16>, vector<32x96xbf16>, vector<8x96xf32> -> vector<8x96xf32>
    %327 = vector.extract_strided_slice %17 {offsets = [48, 0], sizes = [8, 96], strides = [1, 1]} : vector<64x96xf32> to vector<8x96xf32>
    %328 = vector.extract_strided_slice %327 {offsets = [0, 0], sizes = [8, 64], strides = [1, 1]} : vector<8x96xf32> to vector<8x64xf32>
    %329 = vector.extract_strided_slice %326 {offsets = [0, 0], sizes = [8, 64], strides = [1, 1]} : vector<8x96xf32> to vector<8x64xf32>
    %330 = arith.addf %328, %329 : vector<8x64xf32>
    %331 = arith.negf %330 : vector<8x64xf32>
    %332 = math.exp %331 : vector<8x64xf32>
    %cst_62 = arith.constant 1.000000e+00 : f32
    %333 = vector.broadcast %cst_62 : f32 to vector<8x64xf32>
    %334 = arith.addf %333, %332 : vector<8x64xf32>
    %335 = arith.divf %333, %334 : vector<8x64xf32>
    %336 = vector.extract_strided_slice %335 {offsets = [0, 0], sizes = [8, 32], strides = [1, 1]} : vector<8x64xf32> to vector<8x32xf32>
    %337 = vector.extract_strided_slice %335 {offsets = [0, 32], sizes = [8, 32], strides = [1, 1]} : vector<8x64xf32> to vector<8x32xf32>
    %338 = vector.extract_strided_slice %327 {offsets = [0, 64], sizes = [8, 32], strides = [1, 1]} : vector<8x96xf32> to vector<8x32xf32>
    %339 = vector.extract_strided_slice %326 {offsets = [0, 64], sizes = [8, 32], strides = [1, 1]} : vector<8x96xf32> to vector<8x32xf32>
    %340 = arith.addf %339, %5 : vector<8x32xf32>
    %341 = arith.mulf %336, %340 : vector<8x32xf32>
    %342 = arith.addf %338, %341 : vector<8x32xf32>
    %343 = math.tanh %342 : vector<8x32xf32>
    %cst_63 = arith.constant 1.000000e+00 : f32
    %344 = vector.broadcast %cst_63 : f32 to vector<8x32xf32>
    %345 = arith.subf %344, %337 : vector<8x32xf32>
    %346 = arith.mulf %345, %343 : vector<8x32xf32>
    %347 = arith.mulf %337, %297 : vector<8x32xf32>
    %348 = arith.addf %346, %347 : vector<8x32xf32>
    %349 = arith.truncf %348 : vector<8x32xf32> to vector<8x32xbf16>
    %cst_64 = arith.constant dense<0.000000e+00> : vector<8x96xf32>
    %350 = tpu.matmul %349, %2, %cst_64 {dimension_numbers = #tpu.dot_dimension_numbers<[1], [0], [0], [1], [0, 0, 1, 1], [], []>} : vector<8x32xbf16>, vector<32x96xbf16>, vector<8x96xf32> -> vector<8x96xf32>
    %351 = arith.addf %350, %11 : vector<8x96xf32>
    %cst_65 = arith.constant dense<0.000000e+00> : vector<8x96xf32>
    %352 = tpu.matmul %323, %1, %cst_65 {dimension_numbers = #tpu.dot_dimension_numbers<[1], [0], [0], [1], [0, 0, 1, 1], [], []>} : vector<8x32xbf16>, vector<32x96xbf16>, vector<8x96xf32> -> vector<8x96xf32>
    %353 = vector.extract_strided_slice %351 {offsets = [0, 0], sizes = [8, 64], strides = [1, 1]} : vector<8x96xf32> to vector<8x64xf32>
    %354 = vector.extract_strided_slice %352 {offsets = [0, 0], sizes = [8, 64], strides = [1, 1]} : vector<8x96xf32> to vector<8x64xf32>
    %355 = arith.addf %353, %354 : vector<8x64xf32>
    %356 = arith.negf %355 : vector<8x64xf32>
    %357 = math.exp %356 : vector<8x64xf32>
    %cst_66 = arith.constant 1.000000e+00 : f32
    %358 = vector.broadcast %cst_66 : f32 to vector<8x64xf32>
    %359 = arith.addf %358, %357 : vector<8x64xf32>
    %360 = arith.divf %358, %359 : vector<8x64xf32>
    %361 = vector.extract_strided_slice %360 {offsets = [0, 0], sizes = [8, 32], strides = [1, 1]} : vector<8x64xf32> to vector<8x32xf32>
    %362 = vector.extract_strided_slice %360 {offsets = [0, 32], sizes = [8, 32], strides = [1, 1]} : vector<8x64xf32> to vector<8x32xf32>
    %363 = vector.extract_strided_slice %351 {offsets = [0, 64], sizes = [8, 32], strides = [1, 1]} : vector<8x96xf32> to vector<8x32xf32>
    %364 = vector.extract_strided_slice %352 {offsets = [0, 64], sizes = [8, 32], strides = [1, 1]} : vector<8x96xf32> to vector<8x32xf32>
    %365 = arith.addf %364, %8 : vector<8x32xf32>
    %366 = arith.mulf %361, %365 : vector<8x32xf32>
    %367 = arith.addf %363, %366 : vector<8x32xf32>
    %368 = math.tanh %367 : vector<8x32xf32>
    %cst_67 = arith.constant 1.000000e+00 : f32
    %369 = vector.broadcast %cst_67 : f32 to vector<8x32xf32>
    %370 = arith.subf %369, %362 : vector<8x32xf32>
    %371 = arith.mulf %370, %368 : vector<8x32xf32>
    %372 = arith.mulf %362, %322 : vector<8x32xf32>
    %373 = arith.addf %371, %372 : vector<8x32xf32>
    %374 = arith.truncf %373 : vector<8x32xf32> to vector<8x32xbf16>
    %375 = arith.maximumf %324, %373 : vector<8x32xf32>
    %376 = arith.addf %325, %373 : vector<8x32xf32>
    %cst_68 = arith.constant dense<0.000000e+00> : vector<8x96xf32>
    %377 = tpu.matmul %349, %0, %cst_68 {dimension_numbers = #tpu.dot_dimension_numbers<[1], [0], [0], [1], [0, 0, 1, 1], [], []>} : vector<8x32xbf16>, vector<32x96xbf16>, vector<8x96xf32> -> vector<8x96xf32>
    %378 = vector.extract_strided_slice %17 {offsets = [56, 0], sizes = [8, 96], strides = [1, 1]} : vector<64x96xf32> to vector<8x96xf32>
    %379 = vector.extract_strided_slice %378 {offsets = [0, 0], sizes = [8, 64], strides = [1, 1]} : vector<8x96xf32> to vector<8x64xf32>
    %380 = vector.extract_strided_slice %377 {offsets = [0, 0], sizes = [8, 64], strides = [1, 1]} : vector<8x96xf32> to vector<8x64xf32>
    %381 = arith.addf %379, %380 : vector<8x64xf32>
    %382 = arith.negf %381 : vector<8x64xf32>
    %383 = math.exp %382 : vector<8x64xf32>
    %cst_69 = arith.constant 1.000000e+00 : f32
    %384 = vector.broadcast %cst_69 : f32 to vector<8x64xf32>
    %385 = arith.addf %384, %383 : vector<8x64xf32>
    %386 = arith.divf %384, %385 : vector<8x64xf32>
    %387 = vector.extract_strided_slice %386 {offsets = [0, 0], sizes = [8, 32], strides = [1, 1]} : vector<8x64xf32> to vector<8x32xf32>
    %388 = vector.extract_strided_slice %386 {offsets = [0, 32], sizes = [8, 32], strides = [1, 1]} : vector<8x64xf32> to vector<8x32xf32>
    %389 = vector.extract_strided_slice %378 {offsets = [0, 64], sizes = [8, 32], strides = [1, 1]} : vector<8x96xf32> to vector<8x32xf32>
    %390 = vector.extract_strided_slice %377 {offsets = [0, 64], sizes = [8, 32], strides = [1, 1]} : vector<8x96xf32> to vector<8x32xf32>
    %391 = arith.addf %390, %5 : vector<8x32xf32>
    %392 = arith.mulf %387, %391 : vector<8x32xf32>
    %393 = arith.addf %389, %392 : vector<8x32xf32>
    %394 = math.tanh %393 : vector<8x32xf32>
    %cst_70 = arith.constant 1.000000e+00 : f32
    %395 = vector.broadcast %cst_70 : f32 to vector<8x32xf32>
    %396 = arith.subf %395, %388 : vector<8x32xf32>
    %397 = arith.mulf %396, %394 : vector<8x32xf32>
    %398 = arith.mulf %388, %348 : vector<8x32xf32>
    %399 = arith.addf %397, %398 : vector<8x32xf32>
    %400 = arith.truncf %399 : vector<8x32xf32> to vector<8x32xbf16>
    %cst_71 = arith.constant dense<0.000000e+00> : vector<8x96xf32>
    %401 = tpu.matmul %400, %2, %cst_71 {dimension_numbers = #tpu.dot_dimension_numbers<[1], [0], [0], [1], [0, 0, 1, 1], [], []>} : vector<8x32xbf16>, vector<32x96xbf16>, vector<8x96xf32> -> vector<8x96xf32>
    %402 = arith.addf %401, %11 : vector<8x96xf32>
    %cst_72 = arith.constant dense<0.000000e+00> : vector<8x96xf32>
    %403 = tpu.matmul %374, %1, %cst_72 {dimension_numbers = #tpu.dot_dimension_numbers<[1], [0], [0], [1], [0, 0, 1, 1], [], []>} : vector<8x32xbf16>, vector<32x96xbf16>, vector<8x96xf32> -> vector<8x96xf32>
    %404 = vector.extract_strided_slice %402 {offsets = [0, 0], sizes = [8, 64], strides = [1, 1]} : vector<8x96xf32> to vector<8x64xf32>
    %405 = vector.extract_strided_slice %403 {offsets = [0, 0], sizes = [8, 64], strides = [1, 1]} : vector<8x96xf32> to vector<8x64xf32>
    %406 = arith.addf %404, %405 : vector<8x64xf32>
    %407 = arith.negf %406 : vector<8x64xf32>
    %408 = math.exp %407 : vector<8x64xf32>
    %cst_73 = arith.constant 1.000000e+00 : f32
    %409 = vector.broadcast %cst_73 : f32 to vector<8x64xf32>
    %410 = arith.addf %409, %408 : vector<8x64xf32>
    %411 = arith.divf %409, %410 : vector<8x64xf32>
    %412 = vector.extract_strided_slice %411 {offsets = [0, 0], sizes = [8, 32], strides = [1, 1]} : vector<8x64xf32> to vector<8x32xf32>
    %413 = vector.extract_strided_slice %411 {offsets = [0, 32], sizes = [8, 32], strides = [1, 1]} : vector<8x64xf32> to vector<8x32xf32>
    %414 = vector.extract_strided_slice %402 {offsets = [0, 64], sizes = [8, 32], strides = [1, 1]} : vector<8x96xf32> to vector<8x32xf32>
    %415 = vector.extract_strided_slice %403 {offsets = [0, 64], sizes = [8, 32], strides = [1, 1]} : vector<8x96xf32> to vector<8x32xf32>
    %416 = arith.addf %415, %8 : vector<8x32xf32>
    %417 = arith.mulf %412, %416 : vector<8x32xf32>
    %418 = arith.addf %414, %417 : vector<8x32xf32>
    %419 = math.tanh %418 : vector<8x32xf32>
    %cst_74 = arith.constant 1.000000e+00 : f32
    %420 = vector.broadcast %cst_74 : f32 to vector<8x32xf32>
    %421 = arith.subf %420, %413 : vector<8x32xf32>
    %422 = arith.mulf %421, %419 : vector<8x32xf32>
    %423 = arith.mulf %413, %373 : vector<8x32xf32>
    %424 = arith.addf %422, %423 : vector<8x32xf32>
    %425 = arith.maximumf %375, %424 : vector<8x32xf32>
    %426 = arith.addf %376, %424 : vector<8x32xf32>
    %cst_75 = arith.constant 1.250000e-01 : f32
    %427 = vector.broadcast %cst_75 : f32 to vector<8x32xf32>
    %428 = arith.mulf %426, %427 : vector<8x32xf32>
    %429 = tpu.concatenate %425, %428, %424 in 1 : vector<8x32xf32>, vector<8x32xf32>, vector<8x32xf32> -> vector<8x96xf32>
    %c0_76 = arith.constant 0 : index
    %c0_77 = arith.constant 0 : index
    %430 = vector.load %arg9[%c0_76, %c0_77] : memref<96x32xf32, #tpu.memory_space<vmem>>, vector<96x32xf32>
    %cst_78 = arith.constant dense<0.000000e+00> : vector<8x32xf32>
    %431 = tpu.matmul %429, %430, %cst_78 {dimension_numbers = #tpu.dot_dimension_numbers<[1], [0], [0], [1], [0, 0, 1, 1], [], []>} : vector<8x96xf32>, vector<96x32xf32>, vector<8x32xf32> -> vector<8x32xf32>
    %c0_79 = arith.constant 0 : index
    %c0_80 = arith.constant 0 : index
    %432 = vector.load %arg10[%c0_79, %c0_80] : memref<1x32xf32, #tpu.memory_space<vmem>>, vector<1x32xf32>
    %433 = vector.broadcast %432 : vector<1x32xf32> to vector<8x32xf32>
    %434 = arith.addf %431, %433 : vector<8x32xf32>
    %cst_81 = arith.constant 0.000000e+00 : f32
    %435 = vector.broadcast %cst_81 : f32 to vector<8x32xf32>
    %436 = arith.cmpf oge, %434, %435 : vector<8x32xf32>
    %cst_82 = arith.constant 2.000000e-01 : f32
    %437 = vector.broadcast %cst_82 : f32 to vector<8x32xf32>
    %438 = arith.mulf %437, %434 : vector<8x32xf32>
    %439 = arith.select %436, %434, %438 : vector<8x32xi1>, vector<8x32xf32>
    %440 = tpu.concatenate %439, %399, %424 in 1 : vector<8x32xf32>, vector<8x32xf32>, vector<8x32xf32> -> vector<8x96xf32>
    %c0_83 = arith.constant 0 : index
    %c0_84 = arith.constant 0 : index
    %441 = vector.load %arg11[%c0_83, %c0_84] : memref<8x96xf32, #tpu.memory_space<vmem>>, vector<8x96xf32>
    tpu.vector_store %arg11[%c0_83, %c0_84], %440 {strides = array<i32>} : memref<8x96xf32, #tpu.memory_space<vmem>>, vector<8x96xf32>,
    return
  }
}

</mosaic_0001>

<bundles_post_ra>
// kernel: tpu_custom_call.1
= control target key start
LH: loop header
LB: loop body
LE: loop exit
PB: predicated region body
PF: predicated region fallthrough
CT: control target
= control target key end

     0   :  { %vm108_vm0 = vcmask 1043456   ;;  %vm95_vm1 = vcmask 64512   ;;  %s2017_s0 = inlined_call_operand.vmem [shape: bf16[64,8], index: 0, kind: input, shape index: {}]   ;;  %s2018_s1 = inlined_call_operand.vmem [shape: bf16[8,96], index: 1, kind: input, shape index: {}]   ;;  %s2019_s2 = inlined_call_operand.vmem [shape: bf16[32,96], index: 2, kind: input, shape index: {}]   ;;  %s2020_s3 = inlined_call_operand.vmem [shape: f32[1,96], index: 3, kind: input, shape index: {}]   ;;  %s2021_s4 = inlined_call_operand.vmem [shape: f32[1,32], index: 4, kind: input, shape index: {}]   ;;  %s2022_s5 = inlined_call_operand.vmem [shape: bf16[32,96], index: 5, kind: input, shape index: {}]   ;;  %s2023_s6 = inlined_call_operand.vmem [shape: bf16[32,96], index: 6, kind: input, shape index: {}]   ;;  %s2024_s7 = inlined_call_operand.vmem [shape: f32[1,96], index: 7, kind: input, shape index: {}]   ;;  %s2025_s8 = inlined_call_operand.vmem [shape: f32[1,32], index: 8, kind: input, shape index: {}]   ;;  %s2026_s9 = inlined_call_operand.vmem [shape: f32[96,32], index: 9, kind: input, shape index: {}]   ;;  %s2027_s10 = inlined_call_operand.vmem [shape: f32[1,32], index: 10, kind: input, shape index: {}]   ;;  %s2028_s11 = inlined_call_operand.hbm [shape: f32[8,96], index: 11, kind: output, shape index: {}]  }
   0x1   :  { %v1627_v0 = vld [vmem:[%s2019_s2 + $0x8] sm:$0xff]  ;;  %v70_v1 = vld [vmem:[%s2018_s1] sm:$0xf]  ;;  %s1559_s1 = smov 64  }
   0x2   :  { %v110_v2 = vsel %vm108_vm0, %v70_v1, 0  ;;  %v1421_v3 = vld [vmem:[%s2017_s0] sm:$0xff]  ;;  %163 = vmatpush.bf16.msra.mxu1 %v1627_v0 }
   0x3   :  { %119 = vmatpush.bf16.msra.mxu0 %v110_v2  ;;  %v1639_v4 = vld [vmem:[%s2019_s2] sm:$0xff] }
   0x4   :  { %v1430_v5 = vld [vmem:[%s2021_s4] ss:$0 sm:$0xff] }
   0x5   :  { %190 = vrot.lane.b32.xlu0 %v1430_v5, %s1559_s1 }
   0x7   :  { %725 = vmatpush.bf16.msrb.mxu0 %v1627_v0 }
   0x8   :  { %16 = vsyncpa [#allocation3], 0  ;;  %1348 = vmatmul.msk.bf16.vlgmr.msra.gmra.mxu0 %vm95_vm1, %v1421_v3  ;;  %164 = vmatpush.bf16.msra.mxu1 %v1639_v4  ;;  %v1560_v6 = vmov 0   ;;  %v1660_v11 = vld [vmem:[%s2020_s3] ss:$0 sm:$0xff]  ;;  %s1561_s27 = smov 96  }
   0x9   :  { %v1668_v33 = vld [vmem:[%s2023_s6 + $0x8] sm:$0xff]  ;;  %v1674_v34 = vld [vmem:[%s2023_s6] sm:$0xff]  ;;  %vm153_vm6 = vcmask 261120  }
   0xa   :  { %263 = vmatpush.bf16.msra.mxu3 %v1668_v33  ;;  %v1682_v35 = vld [vmem:[%s2022_s5 + $0x8] sm:$0xff]  ;;  %v1689_v36 = vld [vmem:[%s2022_s5] sm:$0xff] }
   0xb   :  { %726 = vmatpush.bf16.msrb.mxu0 %v1639_v4  ;;  %165 = vmatmul.bf16.vlgmr.msra.gmra.mxu1 %v1560_v6  ;;  %v1432_v43 = vld [vmem:[%s2025_s8] ss:$0 sm:$0xff] }
   0xc   :  { %320 = vmatpush.bf16.msrb.mxu1 %v1627_v0  ;;  %238 = vmatpush.bf16.msra.mxu2 %v1682_v35  ;;  %v1721_v51 = vld [vmem:[%s2024_s7] ss:$0 sm:$0xff] }
   0xe   :  { %264 = vmatpush.bf16.msra.mxu3 %v1674_v34 }
   0xf   :  { %920 = vmatpush.bf16.msra.mxu0 %v1682_v35 }
  0x10   :  { %321 = vmatpush.bf16.msrb.mxu1 %v1639_v4  ;;  %239 = vmatpush.bf16.msra.mxu2 %v1689_v36 }
  0x11   :  { %265 = vmatmul.bf16.vlgmr.msra.gmra.mxu3 %v1560_v6 }
  0x12   :  { %399 = vmatpush.bf16.msrb.mxu3 %v1668_v33 }
  0x13   :  { %921 = vmatpush.bf16.msra.mxu0 %v1689_v36 }
  0x14   :  { %455 = vmatpush.bf16.msra.mxu1 %v1627_v0  ;;  %380 = vmatpush.bf16.msrb.mxu2 %v1682_v35 }
  0x16   :  { %400 = vmatpush.bf16.msrb.mxu3 %v1674_v34 }
  0x18   :  { %456 = vmatpush.bf16.msra.mxu1 %v1639_v4  ;;  %381 = vmatpush.bf16.msrb.mxu2 %v1689_v36 }
  0x1a   :  { %534 = vmatpush.bf16.msra.mxu3 %v1668_v33 }
  0x1e   :  { %535 = vmatpush.bf16.msra.mxu3 %v1674_v34 }
  0x77   :  { %v1653_v7 = vpop.permute.xlu0 %190 }
  0x85   :  { %v121_v12 = vpop.f32.mrf.mxu0 }
  0x86   :  { %v122_v13 = vadd.f32 %v1660_v11, %v121_v12 }
  0x88   :  { %v166_v8 = vpop.f32.mrf.mxu1 }
  0x89   :  { %v193_v9 = vadd.f32 %v1653_v7, %v166_v8  ;;  %v170_v14 = vadd.f32 %v166_v8, %v122_v13 }
  0x8b   :  { %195 = vrot.lane.b32.xlu0 %v193_v9, %s1559_s1  ;;  %v1360_v15 = vmul.f32 -1.442695, %v170_v14 }
  0x8d   :  { %1435 = vpow2.f32 %v1360_v15  ;;  %v123_v12 = vpop.f32.mrf.mxu0 }
  0x90   :  { %v168_v10 = vpop.f32.mrf.mxu1 }
  0x93   :  { %v1436_v16 = vpop.eup %1435 }
  0x94   :  { %v174_v17 = vadd.f32 1.0, %v1436_v16  ;;  %v266_v46 = vpop.f32.mrf.mxu3 }
  0x96   :  { %1437 = vrcp.f32 %v174_v17  ;;  %v186_v23 = vand.u32 2147483648, %v174_v17  ;;  %vm180_vm3 = vweird.f32 %v174_v17  ;;  %v184_v24 = vand.u32 2147483647, %v174_v17 }
  0x98   :  { %v187_v26 = vor.u32 1.1754944e-38, %v186_v23  ;;  %vm185_vm5 = vcmp.eq.f32.partialorder %v184_v24, 8.507059e+37 }
  0x9c   :  { %v1438_v18 = vpop.eup %1437  ;;  %v268_v48 = vpop.f32.mrf.mxu3 }
  0x9d   :  { %v176_v19 = vmul.f32 %v1438_v18, %v174_v17  ;;  %vm181_vm2 = vweird.f32 %v1438_v18 }
  0x9e   :  { %vm182_vm4 = vmor %vm180_vm3, %vm181_vm2 }
  0x9f   :  { %v177_v20 = vsub.f32 1.0, %v176_v19 }
  0xa1   :  { %v178_v21 = vmul.f32 %v1438_v18, %v177_v20 }
  0xa3   :  { %v179_v22 = vadd.f32 %v1438_v18, %v178_v21 }
  0xa5   :  { %v183_v25 = vsel %vm182_vm4, %v1438_v18, %v179_v22 }
  0xa6   :  { %v188_v28 = vsel %vm185_vm5, %v187_v26, %v183_v25 }
  0xa7   :  { %v205_v37 = vsub.f32 1.0, %v188_v28  ;;  %v211_v39 = vmul.f32 0.0, %v188_v28 }
  0xfd   :  { %v196_v27 = vpop.permute.xlu0 %195 }
  0xfe   :  { %v198_v29 = vmul.f32 %v196_v27, %v188_v28 }
 0x100   :  { %200 = vrot.lane.b32.xlu1 %v198_v29, %s1559_s1 }
 0x172   :  { %v201_v30 = vpop.permute.xlu1 %200 }
 0x173   :  { %v203_v31 = vadd.f32 %v201_v30, %v122_v13  ;;  %v124_v13 = vadd.f32 %v1660_v11, %v123_v12 }
 0x175   :  { %1439 = vtanh.f32 %v203_v31 }
 0x17b   :  { %v1440_v32 = vpop.eup %1439 }
 0x17c   :  { %207 = vrot.lane.b32.xlu1 %v1440_v32, %s1561_s27 }
 0x1ee   :  { %v208_v38 = vpop.permute.xlu1 %207 }
 0x1ef   :  { %v210_v40 = vmul.f32 %v208_v38, %v205_v37 }
 0x1f1   :  { %v1697_v41 = vadd.f32 %v211_v39, %v210_v40 }
 0x1f3   :  { %v213_v42 = vpack.c.bf16 %v1697_v41, %v1697_v41 }
 0x1f5   :  { %215 = vrot.lane.b32.xlu2 %v213_v42, %s1561_s27 }
 0x1fd   :  { %290 = vrot.lane.b32.xlu2 %v1432_v43, %s1559_s1 }
 0x24f   :  { %v216_v44 = vpop.permute.xlu2 %215 }
 0x250   :  { %1369 = vmatmul.msk.bf16.vlgmr.msra.gmra.mxu2 %vm153_vm6, %v216_v44  ;;  %1379 = vmatmul.msk.bf16.vlgmr.msrb.gmra.mxu1 %vm153_vm6, %v216_v44 }
 0x251   :  { %515 = vmatpush.bf16.msra.mxu2 %v1682_v35  ;;  %590 = vmatpush.bf16.msrb.mxu1 %v1627_v0 }
 0x255   :  { %516 = vmatpush.bf16.msra.mxu2 %v1689_v36  ;;  %591 = vmatpush.bf16.msrb.mxu1 %v1639_v4 }
 0x257   :  { %v1712_v45 = vpop.permute.xlu2 %290 }
 0x258   :  { %v293_v47 = vadd.f32 %v1712_v45, %v266_v46 }
 0x25a   :  { %295 = vrot.lane.b32.xlu0 %v293_v47, %s1559_s1 }
 0x2cc   :  { %v296_v6 = vpop.permute.xlu0 %295 }
 0x2cd   :  { %v323_v49 = vpop.f32.mrf.mxu1 }
 0x2ce   :  { %v347_v50 = vadd.f32 %v323_v49, %v1653_v7  ;;  %v327_v14 = vadd.f32 %v323_v49, %v124_v13 }
 0x2d0   :  { %349 = vrot.lane.b32.xlu1 %v347_v50, %s1559_s1  ;;  %v1380_v15 = vmul.f32 -1.442695, %v327_v14 }
 0x2d3   :  { %v241_v52 = vpop.f32.mrf.mxu2 }
 0x2d4   :  { %v242_v53 = vadd.f32 %v1721_v51, %v241_v52 }
 0x2d5   :  { %v325_v54 = vpop.f32.mrf.mxu1 }
 0x2d6   :  { %v270_v55 = vadd.f32 %v266_v46, %v242_v53 }
 0x2d8   :  { %v1378_v56 = vmul.f32 -1.442695, %v270_v55  ;;  %v1422_v55 = vld [vmem:[%s2017_s0 + $0x8] sm:$0xff] }
 0x2d9   :  { %1349 = vmatmul.msk.bf16.gmra.mxu0 %vm95_vm1, %v1422_v55 }
 0x2da   :  { %1441 = vpow2.f32 %v1378_v56 }
 0x2db   :  { %v243_v57 = vpop.f32.mrf.mxu2 }
 0x2e0   :  { %v1442_v58 = vpop.eup %1441 }
 0x2e1   :  { %v274_v59 = vadd.f32 1.0, %v1442_v58 }
 0x2e3   :  { %1443 = vrcp.f32 %v274_v59  ;;  %v286_v63 = vand.u32 2147483648, %v274_v59  ;;  %v284_v2 = vand.u32 2147483647, %v274_v59  ;;  %vm280_vm8 = vweird.f32 %v274_v59 }
 0x2e4   :  { %1445 = vpow2.f32 %v1380_v15 }
 0x2e5   :  { %v287_v5 = vor.u32 1.1754944e-38, %v286_v63  ;;  %vm285_vm10 = vcmp.eq.f32.partialorder %v284_v2, 8.507059e+37 }
 0x2e9   :  { %v1444_v60 = vpop.eup %1443 }
 0x2ea   :  { %v276_v61 = vmul.f32 %v1444_v60, %v274_v59  ;;  %vm281_vm7 = vweird.f32 %v1444_v60  ;;  %v1446_v16 = vpop.eup %1445 }
 0x2eb   :  { %vm282_vm9 = vmor %vm280_vm8, %vm281_vm7  ;;  %v331_v17 = vadd.f32 1.0, %v1446_v16 }
 0x2ec   :  { %v277_v62 = vsub.f32 1.0, %v276_v61 }
 0x2ed   :  { %1447 = vrcp.f32 %v331_v17  ;;  %v343_v23 = vand.u32 2147483648, %v331_v17  ;;  %vm337_vm12 = vweird.f32 %v331_v17  ;;  %v341_v24 = vand.u32 2147483647, %v331_v17 }
 0x2ee   :  { %v278_v1 = vmul.f32 %v1444_v60, %v277_v62 }
 0x2ef   :  { %v344_v26 = vor.u32 1.1754944e-38, %v343_v23  ;;  %vm342_vm14 = vcmp.eq.f32.partialorder %v341_v24, 8.507059e+37 }
 0x2f0   :  { %v279_v3 = vadd.f32 %v1444_v60, %v278_v1 }
 0x2f2   :  { %v283_v8 = vsel %vm282_vm9, %v1444_v60, %v279_v3 }
 0x2f3   :  { %v288_v9 = vsel %vm285_vm10, %v287_v5, %v283_v8  ;;  %v1448_v18 = vpop.eup %1447 }
 0x2f4   :  { %v298_v10 = vmul.f32 %v296_v6, %v288_v9  ;;  %v333_v19 = vmul.f32 %v1448_v18, %v331_v17  ;;  %vm338_vm11 = vweird.f32 %v1448_v18  ;;  %v305_v40 = vsub.f32 1.0, %v288_v9 }
 0x2f5   :  { %vm339_vm13 = vmor %vm337_vm12, %vm338_vm11  ;;  %v311_v43 = vmul.f32 0.0, %v288_v9 }
 0x2f6   :  { %300 = vrot.lane.b32.xlu2 %v298_v10, %s1559_s1  ;;  %v334_v20 = vsub.f32 1.0, %v333_v19 }
 0x2f8   :  { %v335_v21 = vmul.f32 %v1448_v18, %v334_v20 }
 0x2fa   :  { %v336_v22 = vadd.f32 %v1448_v18, %v335_v21 }
 0x2fc   :  { %v340_v25 = vsel %vm339_vm13, %v1448_v18, %v336_v22 }
 0x2fd   :  { %v345_v28 = vsel %vm342_vm14, %v344_v26, %v340_v25 }
 0x2fe   :  { %v359_v48 = vsub.f32 1.0, %v345_v28  ;;  %v365_v50 = vmul.f32 %v345_v28, %v1697_v41 }
 0x342   :  { %v350_v27 = vpop.permute.xlu1 %349 }
 0x343   :  { %v352_v29 = vmul.f32 %v350_v27, %v345_v28 }
 0x345   :  { %354 = vrot.lane.b32.xlu0 %v352_v29, %s1559_s1 }
 0x350   :  { %v301_v30 = vpop.permute.xlu2 %300 }
 0x351   :  { %v303_v31 = vadd.f32 %v301_v30, %v242_v53 }
 0x353   :  { %1449 = vtanh.f32 %v303_v31 }
 0x356   :  { %v126_v22 = vpop.f32.mrf.mxu0 }
 0x357   :  { %v127_v23 = vadd.f32 %v1660_v11, %v126_v22 }
 0x359   :  { %v1450_v32 = vpop.eup %1449 }
 0x35a   :  { %307 = vrot.lane.b32.xlu1 %v1450_v32, %s1561_s27 }
 0x3b7   :  { %v355_v37 = vpop.permute.xlu0 %354 }
 0x3b8   :  { %v357_v38 = vadd.f32 %v355_v37, %v124_v13 }
 0x3ba   :  { %1451 = vtanh.f32 %v357_v38 }
 0x3c0   :  { %v1452_v39 = vpop.eup %1451 }
 0x3c1   :  { %361 = vrot.lane.b32.xlu2 %v1452_v39, %s1561_s27 }
 0x3cc   :  { %v308_v42 = vpop.permute.xlu1 %307 }
 0x3cd   :  { %v310_v44 = vmul.f32 %v308_v42, %v305_v40 }
 0x3cf   :  { %v1729_v46 = vadd.f32 %v311_v43, %v310_v44 }
 0x3d1   :  { %v313_v47 = vpack.c.bf16 %v1729_v46, %v1729_v46 }
 0x3d3   :  { %388 = vrot.lane.b32.xlu0 %v313_v47, %s1561_s27 }
 0x41b   :  { %v362_v49 = vpop.permute.xlu2 %361 }
 0x41c   :  { %v364_v52 = vmul.f32 %v362_v49, %v359_v48 }
 0x41e   :  { %v1735_v53 = vadd.f32 %v365_v50, %v364_v52 }
 0x420   :  { %v367_v54 = vpack.c.bf16 %v1735_v53, %v1735_v53 }
 0x422   :  { %369 = vrot.lane.b32.xlu1 %v367_v54, %s1561_s27 }
 0x445   :  { %v389_v56 = vpop.permute.xlu0 %388 }
 0x446   :  { %1382 = vmatmul.msk.bf16.vlgmr.msrb.gmra.mxu3 %vm153_vm6, %v389_v56 }
 0x447   :  { %669 = vmatpush.bf16.msrb.mxu3 %v1668_v33 }
 0x44b   :  { %670 = vmatpush.bf16.msrb.mxu3 %v1674_v34 }
 0x494   :  { %v370_v41 = vpop.permute.xlu1 %369 }
 0x495   :  { %1381 = vmatmul.msk.bf16.vlgmr.msrb.gmra.mxu2 %vm153_vm6, %v370_v41  ;;  %1384 = vmatmul.msk.bf16.vlgmr.msra.gmra.mxu1 %vm153_vm6, %v370_v41 }
 0x496   :  { %650 = vmatpush.bf16.msrb.mxu2 %v1682_v35  ;;  %785 = vmatpush.bf16.msra.mxu1 %v1682_v35 }
 0x49a   :  { %651 = vmatpush.bf16.msrb.mxu2 %v1689_v36  ;;  %786 = vmatpush.bf16.msra.mxu1 %v1689_v36 }
 0x4c9   :  { %v402_v57 = vpop.f32.mrf.mxu3 }
 0x4ca   :  { %v426_v58 = vadd.f32 %v402_v57, %v1712_v45 }
 0x4cc   :  { %428 = vrot.lane.b32.xlu2 %v426_v58, %s1559_s1 }
 0x4d1   :  { %v404_v59 = vpop.f32.mrf.mxu3 }
 0x512   :  { %v458_v60 = vpop.f32.mrf.mxu1 }
 0x513   :  { %v482_v61 = vadd.f32 %v458_v60, %v1653_v7  ;;  %v462_v24 = vadd.f32 %v458_v60, %v127_v23 }
 0x515   :  { %484 = vrot.lane.b32.xlu0 %v482_v61, %s1559_s1  ;;  %v1385_v25 = vmul.f32 -1.442695, %v462_v24 }
 0x518   :  { %v383_v62 = vpop.f32.mrf.mxu2 }
 0x519   :  { %v384_v63 = vadd.f32 %v1721_v51, %v383_v62 }
 0x51a   :  { %v460_v1 = vpop.f32.mrf.mxu1 }
 0x51b   :  { %v406_v2 = vadd.f32 %v402_v57, %v384_v63 }
 0x51d   :  { %v1383_v3 = vmul.f32 -1.442695, %v406_v2 }
 0x51f   :  { %1453 = vpow2.f32 %v1383_v3 }
 0x520   :  { %v385_v5 = vpop.f32.mrf.mxu2 }
 0x525   :  { %v1454_v6 = vpop.eup %1453 }
 0x526   :  { %v410_v8 = vadd.f32 1.0, %v1454_v6  ;;  %v429_v19 = vpop.permute.xlu2 %428 }
 0x528   :  { %1455 = vrcp.f32 %v410_v8  ;;  %v422_v13 = vand.u32 2147483648, %v410_v8  ;;  %v420_v15 = vand.u32 2147483647, %v410_v8  ;;  %vm416_vm0 = vweird.f32 %v410_v8 }
 0x529   :  { %1457 = vpow2.f32 %v1385_v25 }
 0x52a   :  { %v423_v17 = vor.u32 1.1754944e-38, %v422_v13  ;;  %vm421_vm3 = vcmp.eq.f32.partialorder %v420_v15, 8.507059e+37 }
 0x52e   :  { %v1456_v9 = vpop.eup %1455 }
 0x52f   :  { %v412_v10 = vmul.f32 %v1456_v9, %v410_v8  ;;  %vm417_vm15 = vweird.f32 %v1456_v9  ;;  %v1458_v26 = vpop.eup %1457 }
 0x530   :  { %vm418_vm2 = vmor %vm416_vm0, %vm417_vm15  ;;  %v466_v27 = vadd.f32 1.0, %v1458_v26  ;;  %v128_v26 = vpop.f32.mrf.mxu0 }
 0x531   :  { %v413_v12 = vsub.f32 1.0, %v412_v10 }
 0x532   :  { %1459 = vrcp.f32 %v466_v27  ;;  %v478_v37 = vand.u32 2147483648, %v466_v27  ;;  %vm472_vm5 = vweird.f32 %v466_v27  ;;  %v476_v38 = vand.u32 2147483647, %v466_v27 }
 0x533   :  { %v414_v14 = vmul.f32 %v1456_v9, %v413_v12 }
 0x534   :  { %v479_v40 = vor.u32 1.1754944e-38, %v478_v37  ;;  %vm477_vm8 = vcmp.eq.f32.partialorder %v476_v38, 8.507059e+37 }
 0x535   :  { %v415_v16 = vadd.f32 %v1456_v9, %v414_v14 }
 0x537   :  { %v419_v18 = vsel %vm418_vm2, %v1456_v9, %v415_v16 }
 0x538   :  { %v424_v20 = vsel %vm421_vm3, %v423_v17, %v419_v18  ;;  %v1460_v28 = vpop.eup %1459 }
 0x539   :  { %v431_v21 = vmul.f32 %v429_v19, %v424_v20  ;;  %v468_v29 = vmul.f32 %v1460_v28, %v466_v27  ;;  %vm473_vm4 = vweird.f32 %v1460_v28  ;;  %v438_v55 = vsub.f32 1.0, %v424_v20 }
 0x53a   :  { %vm474_vm7 = vmor %vm472_vm5, %vm473_vm4  ;;  %v444_v41 = vmul.f32 %v424_v20, %v1729_v46 }
 0x53b   :  { %433 = vrot.lane.b32.xlu1 %v431_v21, %s1559_s1  ;;  %v469_v30 = vsub.f32 1.0, %v468_v29  ;;  %v129_v29 = vadd.f32 %v1660_v11, %v128_v26 }
 0x53d   :  { %v470_v31 = vmul.f32 %v1460_v28, %v469_v30 }
 0x53f   :  { %v471_v32 = vadd.f32 %v1460_v28, %v470_v31 }
 0x541   :  { %v475_v39 = vsel %vm474_vm7, %v1460_v28, %v471_v32 }
 0x542   :  { %v480_v43 = vsel %vm477_vm8, %v479_v40, %v475_v39 }
 0x543   :  { %v494_v60 = vsub.f32 1.0, %v480_v43  ;;  %v500_v62 = vmul.f32 %v480_v43, %v1735_v53 }
 0x587   :  { %v485_v42 = vpop.permute.xlu0 %484 }
 0x588   :  { %v487_v44 = vmul.f32 %v485_v42, %v480_v43 }
 0x58a   :  { %489 = vrot.lane.b32.xlu2 %v487_v44, %s1559_s1 }
 0x5ad   :  { %v434_v47 = vpop.permute.xlu1 %433 }
 0x5ae   :  { %v436_v48 = vadd.f32 %v434_v47, %v384_v63 }
 0x5b0   :  { %1461 = vtanh.f32 %v436_v48 }
 0x5b6   :  { %v1462_v49 = vpop.eup %1461 }
 0x5b7   :  { %440 = vrot.lane.b32.xlu0 %v1462_v49, %s1561_s27 }
 0x5e4   :  { %v490_v50 = vpop.permute.xlu2 %489 }
 0x5e5   :  { %v492_v52 = vadd.f32 %v490_v50, %v127_v23 }
 0x5e7   :  { %1463 = vtanh.f32 %v492_v52 }
 0x5ed   :  { %v1464_v54 = vpop.eup %1463 }
 0x5ee   :  { %496 = vrot.lane.b32.xlu1 %v1464_v54, %s1561_s27 }
 0x629   :  { %v441_v56 = vpop.permute.xlu0 %440 }
 0x62a   :  { %v443_v57 = vmul.f32 %v441_v56, %v438_v55 }
 0x62c   :  { %v1764_v58 = vadd.f32 %v444_v41, %v443_v57 }
 0x62e   :  { %v446_v59 = vpack.c.bf16 %v1764_v58, %v1764_v58 }
 0x630   :  { %523 = vrot.lane.b32.xlu2 %v446_v59, %s1561_s27 }
 0x660   :  { %v497_v61 = vpop.permute.xlu1 %496 }
 0x661   :  { %v499_v63 = vmul.f32 %v497_v61, %v494_v60 }
 0x663   :  { %v1770_v1 = vadd.f32 %v500_v62, %v499_v63 }
 0x665   :  { %v502_v2 = vpack.c.bf16 %v1770_v1, %v1770_v1 }
 0x667   :  { %504 = vrot.lane.b32.xlu0 %v502_v2, %s1561_s27 }
 0x68a   :  { %v524_v3 = vpop.permute.xlu2 %523 }
 0x68b   :  { %1387 = vmatmul.msk.bf16.vlgmr.msra.gmra.mxu3 %vm153_vm6, %v524_v3 }
 0x68c   :  { %860 = vmatpush.bf16.msra.mxu3 %v1627_v0 }
 0x690   :  { %861 = vmatpush.bf16.msra.mxu3 %v1639_v4 }
 0x6d9   :  { %v505_v5 = vpop.permute.xlu0 %504 }
 0x6da   :  { %1386 = vmatmul.msk.bf16.vlgmr.msra.gmra.mxu2 %vm153_vm6, %v505_v5  ;;  %1389 = vmatmul.msk.bf16.vlgmr.msrb.gmra.mxu1 %vm153_vm6, %v505_v5 }
 0x6db   :  { %804 = vmatpush.bf16.msra.mxu2 %v1668_v33  ;;  %939 = vmatpush.bf16.msrb.mxu1 %v1668_v33 }
 0x6df   :  { %805 = vmatpush.bf16.msra.mxu2 %v1674_v34  ;;  %940 = vmatpush.bf16.msrb.mxu1 %v1674_v34 }
 0x70e   :  { %v537_v53 = vpop.f32.mrf.mxu3 }
 0x70f   :  { %v561_v6 = vadd.f32 %v537_v53, %v1712_v45 }
 0x711   :  { %563 = vrot.lane.b32.xlu1 %v561_v6, %s1559_s1 }
 0x716   :  { %v539_v8 = vpop.f32.mrf.mxu3 }
 0x757   :  { %v593_v9 = vpop.f32.mrf.mxu1 }
 0x758   :  { %v617_v10 = vadd.f32 %v593_v9, %v1653_v7  ;;  %v597_v31 = vadd.f32 %v593_v9, %v129_v29 }
 0x75a   :  { %619 = vrot.lane.b32.xlu2 %v617_v10, %s1559_s1  ;;  %v1390_v39 = vmul.f32 -1.442695, %v597_v31 }
 0x75d   :  { %v518_v12 = vpop.f32.mrf.mxu2 }
 0x75e   :  { %v519_v13 = vadd.f32 %v1721_v51, %v518_v12 }
 0x75f   :  { %v595_v14 = vpop.f32.mrf.mxu1 }
 0x760   :  { %v541_v15 = vadd.f32 %v537_v53, %v519_v13 }
 0x762   :  { %v1388_v16 = vmul.f32 -1.442695, %v541_v15 }
 0x764   :  { %1465 = vpow2.f32 %v1388_v16 }
 0x765   :  { %v520_v17 = vpop.f32.mrf.mxu2 }
 0x766   :  { %v1423_v17 = vld [vmem:[%s2017_s0 + $0x10] sm:$0xff] }
 0x767   :  { %1350 = vmatmul.msk.bf16.gmra.mxu0 %vm95_vm1, %v1423_v17 }
 0x76a   :  { %v1466_v18 = vpop.eup %1465 }
 0x76b   :  { %v545_v19 = vadd.f32 1.0, %v1466_v18  ;;  %v1424_v18 = vld [vmem:[%s2017_s0 + $0x18] sm:$0xff] }
 0x76d   :  { %1467 = vrcp.f32 %v545_v19  ;;  %v557_v25 = vand.u32 2147483648, %v545_v19  ;;  %vm551_vm10 = vweird.f32 %v545_v19  ;;  %v555_v27 = vand.u32 2147483647, %v545_v19 }
 0x76e   :  { %1469 = vpow2.f32 %v1390_v39 }
 0x76f   :  { %v558_v30 = vor.u32 1.1754944e-38, %v557_v25  ;;  %vm556_vm12 = vcmp.eq.f32.partialorder %v555_v27, 8.507059e+37 }
 0x773   :  { %v1468_v20 = vpop.eup %1467 }
 0x774   :  { %v547_v21 = vmul.f32 %v1468_v20, %v545_v19  ;;  %vm552_vm9 = vweird.f32 %v1468_v20  ;;  %v1470_v40 = vpop.eup %1469 }
 0x775   :  { %vm553_vm11 = vmor %vm551_vm10, %vm552_vm9  ;;  %v601_v42 = vadd.f32 1.0, %v1470_v40 }
 0x776   :  { %v548_v22 = vsub.f32 1.0, %v547_v21 }
 0x777   :  { %1471 = vrcp.f32 %v601_v42  ;;  %v613_v50 = vand.u32 2147483648, %v601_v42  ;;  %vm607_vm14 = vweird.f32 %v601_v42  ;;  %v611_v52 = vand.u32 2147483647, %v601_v42  ;;  %1351 = vmatmul.msk.bf16.gmra.mxu0 %vm95_vm1, %v1424_v18 }
 0x778   :  { %v549_v23 = vmul.f32 %v1468_v20, %v548_v22 }
 0x779   :  { %v614_v55 = vor.u32 1.1754944e-38, %v613_v50  ;;  %vm612_vm0 = vcmp.eq.f32.partialorder %v611_v52, 8.507059e+37 }
 0x77a   :  { %v550_v24 = vadd.f32 %v1468_v20, %v549_v23 }
 0x77c   :  { %v554_v28 = vsel %vm553_vm11, %v1468_v20, %v550_v24 }
 0x77d   :  { %v559_v37 = vsel %vm556_vm12, %v558_v30, %v554_v28  ;;  %v1472_v43 = vpop.eup %1471 }
 0x77e   :  { %v603_v44 = vmul.f32 %v1472_v43, %v601_v42  ;;  %vm608_vm13 = vweird.f32 %v1472_v43  ;;  %v573_v3 = vsub.f32 1.0, %v559_v37  ;;  %v579_v53 = vmul.f32 %v559_v37, %v1764_v58 }
 0x77f   :  { %vm609_vm15 = vmor %vm607_vm14, %vm608_vm13 }
 0x780   :  { %v604_v47 = vsub.f32 1.0, %v603_v44 }
 0x782   :  { %v605_v48 = vmul.f32 %v1472_v43, %v604_v47 }
 0x783   :  { %v564_v32 = vpop.permute.xlu1 %563 }
 0x784   :  { %v566_v38 = vmul.f32 %v564_v32, %v559_v37  ;;  %v606_v49 = vadd.f32 %v1472_v43, %v605_v48 }
 0x786   :  { %568 = vrot.lane.b32.xlu0 %v566_v38, %s1559_s1  ;;  %v610_v54 = vsel %vm609_vm15, %v1472_v43, %v606_v49 }
 0x787   :  { %v615_v41 = vsel %vm612_vm0, %v614_v55, %v610_v54 }
 0x788   :  { %v629_v10 = vsub.f32 1.0, %v615_v41 }
 0x7b4   :  { %v620_v56 = vpop.permute.xlu2 %619 }
 0x7b5   :  { %v622_v57 = vmul.f32 %v620_v56, %v615_v41 }
 0x7b7   :  { %624 = vrot.lane.b32.xlu1 %v622_v57, %s1559_s1 }
 0x7e4   :  { %v131_v22 = vpop.f32.mrf.mxu0 }
 0x7e5   :  { %v132_v48 = vadd.f32 %v1660_v11, %v131_v22 }
 0x7ec   :  { %v1825_v24 = vpop.f32.mrf.mxu0 }
 0x7f4   :  { %v1827_v25 = vpop.f32.mrf.mxu0 }
 0x7f8   :  { %v569_v59 = vpop.permute.xlu0 %568 }
 0x7f9   :  { %v571_v60 = vadd.f32 %v569_v59, %v519_v13  ;;  %v635_v13 = vmul.f32 %v615_v41, %v1770_v1 }
 0x7fb   :  { %1473 = vtanh.f32 %v571_v60 }
 0x7fc   :  { %v1829_v26 = vpop.f32.mrf.mxu0 }
 0x801   :  { %v1474_v61 = vpop.eup %1473 }
 0x802   :  { %575 = vrot.lane.b32.xlu2 %v1474_v61, %s1561_s27 }
 0x829   :  { %v625_v62 = vpop.permute.xlu1 %624 }
 0x82a   :  { %v627_v63 = vadd.f32 %v625_v62, %v129_v29 }
 0x82c   :  { %1475 = vtanh.f32 %v627_v63 }
 0x832   :  { %v1476_v2 = vpop.eup %1475 }
 0x833   :  { %631 = vrot.lane.b32.xlu0 %v1476_v2, %s1561_s27 }
 0x85c   :  { %v576_v5 = vpop.permute.xlu2 %575 }
 0x85d   :  { %v578_v6 = vmul.f32 %v576_v5, %v573_v3 }
 0x85f   :  { %v1795_v8 = vadd.f32 %v579_v53, %v578_v6 }
 0x861   :  { %v581_v9 = vpack.c.bf16 %v1795_v8, %v1795_v8 }
 0x863   :  { %658 = vrot.lane.b32.xlu1 %v581_v9, %s1561_s27 }
 0x8a5   :  { %v632_v12 = vpop.permute.xlu0 %631 }
 0x8a6   :  { %v634_v14 = vmul.f32 %v632_v12, %v629_v10 }
 0x8a8   :  { %v1801_v15 = vadd.f32 %v635_v13, %v634_v14 }
 0x8aa   :  { %v637_v16 = vpack.c.bf16 %v1801_v15, %v1801_v15 }
 0x8ac   :  { %639 = vrot.lane.b32.xlu2 %v637_v16, %s1561_s27 }
 0x8d5   :  { %v659_v1 = vpop.permute.xlu1 %658 }
 0x8d6   :  { %1392 = vmatmul.msk.bf16.vlgmr.msrb.gmra.mxu3 %vm153_vm6, %v659_v1 }
 0x8d7   :  { %1055 = vmatpush.bf16.msrb.mxu3 %v1682_v35 }
 0x8db   :  { %1056 = vmatpush.bf16.msrb.mxu3 %v1689_v36 }
 0x906   :  { %v640_v19 = vpop.permute.xlu2 %639 }
 0x907   :  { %1391 = vmatmul.msk.bf16.vlgmr.msrb.gmra.mxu2 %vm153_vm6, %v640_v19  ;;  %1394 = vmatmul.msk.bf16.vlgmr.msrb.gmra.mxu0 %vm153_vm6, %v640_v19 }
 0x908   :  { %995 = vmatpush.bf16.msrb.mxu2 %v1627_v0  ;;  %1074 = vmatpush.bf16.msrb.mxu0 %v1668_v33 }
 0x90c   :  { %996 = vmatpush.bf16.msrb.mxu2 %v1639_v4  ;;  %1075 = vmatpush.bf16.msrb.mxu0 %v1674_v34 }
 0x959   :  { %v672_v20 = vpop.f32.mrf.mxu3 }
 0x95a   :  { %v696_v21 = vadd.f32 %v672_v20, %v1712_v45 }
 0x95c   :  { %698 = vrot.lane.b32.xlu1 %v696_v21, %s1559_s1 }
 0x961   :  { %v674_v23 = vpop.f32.mrf.mxu3 }
 0x984   :  { %v728_v27 = vpop.f32.mrf.mxu0 }
 0x985   :  { %v752_v28 = vadd.f32 %v728_v27, %v1653_v7  ;;  %v732_v50 = vadd.f32 %v728_v27, %v132_v48 }
 0x987   :  { %754 = vrot.lane.b32.xlu0 %v752_v28, %s1559_s1  ;;  %v1395_v56 = vmul.f32 -1.442695, %v732_v50 }
 0x98a   :  { %v653_v29 = vpop.f32.mrf.mxu2 }
 0x98b   :  { %v654_v32 = vadd.f32 %v1721_v51, %v653_v29 }
 0x98c   :  { %v730_v30 = vpop.f32.mrf.mxu0 }
 0x98d   :  { %v676_v37 = vadd.f32 %v672_v20, %v654_v32 }
 0x98f   :  { %v1393_v38 = vmul.f32 -1.442695, %v676_v37 }
 0x991   :  { %1477 = vpow2.f32 %v1393_v38 }
 0x992   :  { %v655_v31 = vpop.f32.mrf.mxu2 }
 0x997   :  { %v1478_v39 = vpop.eup %1477 }
 0x998   :  { %v680_v40 = vadd.f32 1.0, %v1478_v39 }
 0x99a   :  { %1479 = vrcp.f32 %v680_v40  ;;  %v692_v52 = vand.u32 2147483648, %v680_v40  ;;  %vm686_vm2 = vweird.f32 %v680_v40  ;;  %v690_v54 = vand.u32 2147483647, %v680_v40 }
 0x99b   :  { %1481 = vpow2.f32 %v1395_v56 }
 0x99c   :  { %v693_v41 = vor.u32 1.1754944e-38, %v692_v52  ;;  %vm691_vm4 = vcmp.eq.f32.partialorder %v690_v54, 8.507059e+37  ;;  %v134_v52 = vadd.f32 %v1660_v11, %v1825_v24 }
 0x9a0   :  { %v1480_v42 = vpop.eup %1479 }
 0x9a1   :  { %v682_v43 = vmul.f32 %v1480_v42, %v680_v40  ;;  %vm687_vm1 = vweird.f32 %v1480_v42  ;;  %v1482_v61 = vpop.eup %1481 }
 0x9a2   :  { %vm688_vm3 = vmor %vm686_vm2, %vm687_vm1  ;;  %v736_v62 = vadd.f32 1.0, %v1482_v61 }
 0x9a3   :  { %v683_v44 = vsub.f32 1.0, %v682_v43 }
 0x9a4   :  { %1483 = vrcp.f32 %v736_v62  ;;  %v748_v6 = vand.u32 2147483648, %v736_v62  ;;  %vm742_vm7 = vweird.f32 %v736_v62  ;;  %v746_v9 = vand.u32 2147483647, %v736_v62 }
 0x9a5   :  { %v684_v47 = vmul.f32 %v1480_v42, %v683_v44 }
 0x9a6   :  { %v749_v12 = vor.u32 1.1754944e-38, %v748_v6  ;;  %vm747_vm9 = vcmp.eq.f32.partialorder %v746_v9, 8.507059e+37 }
 0x9a7   :  { %v685_v49 = vadd.f32 %v1480_v42, %v684_v47 }
 0x9a9   :  { %v689_v55 = vsel %vm688_vm3, %v1480_v42, %v685_v49 }
 0x9aa   :  { %v694_v59 = vsel %vm691_vm4, %v693_v41, %v689_v55  ;;  %v1484_v63 = vpop.eup %1483 }
 0x9ab   :  { %v738_v2 = vmul.f32 %v1484_v63, %v736_v62  ;;  %vm743_vm5 = vweird.f32 %v1484_v63  ;;  %v708_v22 = vsub.f32 1.0, %v694_v59  ;;  %v714_v27 = vmul.f32 %v694_v59, %v1795_v8 }
 0x9ac   :  { %vm744_vm8 = vmor %vm742_vm7, %vm743_vm5 }
 0x9ad   :  { %v739_v3 = vsub.f32 1.0, %v738_v2 }
 0x9af   :  { %v740_v5 = vmul.f32 %v1484_v63, %v739_v3 }
 0x9b1   :  { %v741_v53 = vadd.f32 %v1484_v63, %v740_v5 }
 0x9b3   :  { %v745_v10 = vsel %vm744_vm8, %v1484_v63, %v741_v53 }
 0x9b4   :  { %v750_v14 = vsel %vm747_vm9, %v749_v12, %v745_v10 }
 0x9b5   :  { %v764_v31 = vsub.f32 1.0, %v750_v14  ;;  %v770_v37 = vmul.f32 %v750_v14, %v1801_v15 }
 0x9ce   :  { %v699_v57 = vpop.permute.xlu1 %698 }
 0x9cf   :  { %v701_v60 = vmul.f32 %v699_v57, %v694_v59 }
 0x9d1   :  { %703 = vrot.lane.b32.xlu0 %v701_v60, %s1559_s1 }
 0x9f9   :  { %v755_v13 = vpop.permute.xlu0 %754 }
 0x9fa   :  { %v757_v16 = vmul.f32 %v755_v13, %v750_v14 }
 0x9fc   :  { %759 = vrot.lane.b32.xlu2 %v757_v16, %s1559_s1 }
 0xa43   :  { %v704_v17 = vpop.permute.xlu0 %703 }
 0xa44   :  { %v706_v18 = vadd.f32 %v704_v17, %v654_v32 }
 0xa46   :  { %1485 = vtanh.f32 %v706_v18 }
 0xa4c   :  { %v1486_v1 = vpop.eup %1485 }
 0xa4d   :  { %710 = vrot.lane.b32.xlu2 %v1486_v1, %s1561_s27 }
 0xa56   :  { %v760_v19 = vpop.permute.xlu2 %759 }
 0xa57   :  { %v762_v20 = vadd.f32 %v760_v19, %v132_v48 }
 0xa59   :  { %1487 = vtanh.f32 %v762_v20 }
 0xa5f   :  { %v1488_v21 = vpop.eup %1487 }
 0xa60   :  { %766 = vrot.lane.b32.xlu1 %v1488_v21, %s1561_s27 }
 0xaa7   :  { %v711_v23 = vpop.permute.xlu2 %710 }
 0xaa8   :  { %v713_v28 = vmul.f32 %v711_v23, %v708_v22 }
 0xaaa   :  { %v1840_v29 = vadd.f32 %v714_v27, %v713_v28 }
 0xaac   :  { %v716_v30 = vpack.c.bf16 %v1840_v29, %v1840_v29 }
 0xaae   :  { %793 = vrot.lane.b32.xlu1 %v716_v30, %s1561_s27 }
 0xad2   :  { %v767_v32 = vpop.permute.xlu1 %766 }
 0xad3   :  { %v769_v38 = vmul.f32 %v767_v32, %v764_v31 }
 0xad5   :  { %v1846_v39 = vadd.f32 %v770_v37, %v769_v38 }
 0xad7   :  { %v772_v40 = vpack.c.bf16 %v1846_v39, %v1846_v39 }
 0xad9   :  { %774 = vrot.lane.b32.xlu0 %v772_v40, %s1561_s27 }
 0xb20   :  { %v794_v42 = vpop.permute.xlu1 %793 }
 0xb21   :  { %1397 = vmatmul.msk.bf16.vlgmr.msra.gmra.mxu2 %vm153_vm6, %v794_v42 }
 0xb22   :  { %1190 = vmatpush.bf16.msra.mxu2 %v1682_v35 }
 0xb26   :  { %1191 = vmatpush.bf16.msra.mxu2 %v1689_v36 }
 0xb4b   :  { %v775_v43 = vpop.permute.xlu0 %774 }
 0xb4c   :  { %1396 = vmatmul.msk.bf16.vlgmr.msra.gmra.mxu1 %vm153_vm6, %v775_v43  ;;  %1399 = vmatmul.msk.bf16.vlgmr.msra.gmra.mxu3 %vm153_vm6, %v775_v43 }
 0xb4d   :  { %1130 = vmatpush.bf16.msra.mxu1 %v1627_v0  ;;  %1209 = vmatpush.bf16.msra.mxu3 %v1668_v33 }
 0xb51   :  { %1131 = vmatpush.bf16.msra.mxu1 %v1639_v4  ;;  %1210 = vmatpush.bf16.msra.mxu3 %v1674_v34 }
 0xba4   :  { %v807_v15 = vpop.f32.mrf.mxu2 }
 0xba5   :  { %v831_v44 = vadd.f32 %v807_v15, %v1712_v45 }
 0xba7   :  { %833 = vrot.lane.b32.xlu0 %v831_v44, %s1559_s1 }
 0xbac   :  { %v809_v35 = vpop.f32.mrf.mxu2 }
 0xbc9   :  { %v788_v36 = vpop.f32.mrf.mxu1 }
 0xbca   :  { %v789_v33 = vadd.f32 %v1721_v51, %v788_v36 }
 0xbcc   :  { %v811_v50 = vadd.f32 %v807_v15, %v789_v33 }
 0xbce   :  { %v1398_v4 = vmul.f32 -1.442695, %v811_v50 }
 0xbcf   :  { %v863_v47 = vpop.f32.mrf.mxu3 }
 0xbd0   :  { %v887_v48 = vadd.f32 %v863_v47, %v1653_v7  ;;  %1489 = vpow2.f32 %v1398_v4  ;;  %v867_v55 = vadd.f32 %v863_v47, %v134_v52 }
 0xbd1   :  { %v790_v49 = vpop.f32.mrf.mxu1 }
 0xbd2   :  { %889 = vrot.lane.b32.xlu2 %v887_v48, %s1559_s1  ;;  %v1400_v56 = vmul.f32 -1.442695, %v867_v55 }
 0xbd6   :  { %v1490_v34 = vpop.eup %1489 }
 0xbd7   :  { %v865_v0 = vpop.f32.mrf.mxu3  ;;  %v815_v54 = vadd.f32 1.0, %v1490_v34 }
 0xbd9   :  { %1491 = vrcp.f32 %v815_v54  ;;  %v827_v2 = vand.u32 2147483648, %v815_v54  ;;  %vm821_vm11 = vweird.f32 %v815_v54  ;;  %v825_v3 = vand.u32 2147483647, %v815_v54 }
 0xbda   :  { %1493 = vpow2.f32 %v1400_v56 }
 0xbdb   :  { %v828_v24 = vor.u32 1.1754944e-38, %v827_v2  ;;  %vm826_vm13 = vcmp.eq.f32.partialorder %v825_v3, 8.507059e+37 }
 0xbdf   :  { %v1492_v41 = vpop.eup %1491 }
 0xbe0   :  { %v817_v57 = vmul.f32 %v1492_v41, %v815_v54  ;;  %v1494_v59 = vpop.eup %1493  ;;  %vm822_vm10 = vweird.f32 %v1492_v41 }
 0xbe1   :  { %v871_v61 = vadd.f32 1.0, %v1494_v59  ;;  %vm823_vm12 = vmor %vm821_vm11, %vm822_vm10 }
 0xbe2   :  { %v818_v60 = vsub.f32 1.0, %v817_v57 }
 0xbe3   :  { %1495 = vrcp.f32 %v871_v61  ;;  %v883_v16 = vand.u32 2147483648, %v871_v61  ;;  %vm877_vm15 = vweird.f32 %v871_v61  ;;  %v881_v17 = vand.u32 2147483647, %v871_v61 }
 0xbe4   :  { %v819_v62 = vmul.f32 %v1492_v41, %v818_v60 }
 0xbe5   :  { %v884_v1 = vor.u32 1.1754944e-38, %v883_v16  ;;  %vm882_vm1 = vcmp.eq.f32.partialorder %v881_v17, 8.507059e+37 }
 0xbe6   :  { %v820_v63 = vadd.f32 %v1492_v41, %v819_v62 }
 0xbe8   :  { %v824_v11 = vsel %vm823_vm12, %v1492_v41, %v820_v63  ;;  %v1894_v41 = vld [vmem:[%s2020_s3] ss:$0 sm:$0xff]  ;;  %s1563_s3 = smov [#allocation2]  }
 0xbe9   :  { %v1496_v5 = vpop.eup %1495  ;;  %v829_v6 = vsel %vm826_vm13, %v828_v24, %v824_v11  ;;  %v137_v57 = vadd.f32 %v1894_v41, %v1827_v25  ;;  %s1321_s25 = sshll.u32 %s1563_s3, 4  ;;  %s1322_s25 = int_to_ptr.vmem [resolvable:$true] %s1321_s25 }
 0xbea   :  { %v873_v9 = vmul.f32 %v1496_v5, %v871_v61  ;;  %vm878_vm14 = vweird.f32 %v1496_v5  ;;  %v843_v32 = vsub.f32 1.0, %v829_v6  ;;  %v849_v38 = vmul.f32 %v829_v6, %v1840_v29 }
 0xbeb   :  { %vm879_vm0 = vmor %vm877_vm15, %vm878_vm14 }
 0xbec   :  { %v874_v12 = vsub.f32 1.0, %v873_v9 }
 0xbee   :  { %v875_v13 = vmul.f32 %v1496_v5, %v874_v12 }
 0xbf0   :  { %v876_v14 = vadd.f32 %v1496_v5, %v875_v13 }
 0xbf2   :  { %v880_v18 = vsel %vm879_vm0, %v1496_v5, %v876_v14 }
 0xbf3   :  { %v885_v20 = vsel %vm882_vm1, %v884_v1, %v880_v18 }
 0xbf4   :  { %v899_v15 = vsub.f32 1.0, %v885_v20  ;;  %v905_v35 = vmul.f32 %v885_v20, %v1846_v39 }
 0xc19   :  { %v834_v53 = vpop.permute.xlu0 %833 }
 0xc1a   :  { %v836_v10 = vmul.f32 %v834_v53, %v829_v6 }
 0xc1c   :  { %838 = vrot.lane.b32.xlu2 %v836_v10, %s1559_s1 }
 0xc2c   :  { %v890_v19 = vpop.permute.xlu2 %889 }
 0xc2d   :  { %v892_v21 = vmul.f32 %v890_v19, %v885_v20 }
 0xc2f   :  { %894 = vrot.lane.b32.xlu1 %v892_v21, %s1559_s1 }
 0xc76   :  { %v839_v22 = vpop.permute.xlu2 %838 }
 0xc77   :  { %v841_v23 = vadd.f32 %v839_v22, %v789_v33 }
 0xc79   :  { %1497 = vtanh.f32 %v841_v23 }
 0xc7f   :  { %v1498_v27 = vpop.eup %1497 }
 0xc80   :  { %845 = vrot.lane.b32.xlu1 %v1498_v27, %s1561_s27 }
 0xca1   :  { %v895_v28 = vpop.permute.xlu1 %894 }
 0xca2   :  { %v897_v30 = vadd.f32 %v895_v28, %v134_v52 }
 0xca4   :  { %1499 = vtanh.f32 %v897_v30 }
 0xcaa   :  { %v1500_v31 = vpop.eup %1499 }
 0xcab   :  { %901 = vrot.lane.b32.xlu0 %v1500_v31, %s1561_s27 }
 0xcf2   :  { %v846_v37 = vpop.permute.xlu1 %845 }
 0xcf3   :  { %v848_v40 = vmul.f32 %v846_v37, %v843_v32 }
 0xcf5   :  { %v1872_v42 = vadd.f32 %v849_v38, %v848_v40 }
 0xcf7   :  { %v851_v43 = vpack.c.bf16 %v1872_v42, %v1872_v42 }
 0xcf9   :  { %928 = vrot.lane.b32.xlu0 %v851_v43, %s1561_s27 }
 0xd1d   :  { %v902_v44 = vpop.permute.xlu0 %901 }
 0xd1e   :  { %v904_v36 = vmul.f32 %v902_v44, %v899_v15 }
 0xd20   :  { %v1878_v47 = vadd.f32 %v905_v35, %v904_v36 }
 0xd22   :  { %v907_v48 = vpack.c.bf16 %v1878_v47, %v1878_v47 }
 0xd24   :  { %909 = vrot.lane.b32.xlu2 %v907_v48, %s1561_s27 }
 0xd6b   :  { %v929_v49 = vpop.permute.xlu0 %928 }
 0xd6c   :  { %1402 = vmatmul.msk.bf16.vlgmr.msrb.gmra.mxu1 %vm153_vm6, %v929_v49 }
 0xd7e   :  { %v910_v0 = vpop.permute.xlu2 %909 }
 0xd7f   :  { %1401 = vmatmul.msk.bf16.vlgmr.msra.gmra.mxu0 %vm153_vm6, %v910_v0  ;;  %1404 = vmatmul.msk.bf16.vlgmr.msrb.gmra.mxu2 %vm153_vm6, %v910_v0 }
 0xde9   :  { %v942_v33 = vpop.f32.mrf.mxu1 }
 0xdea   :  { %v966_v50 = vadd.f32 %v942_v33, %v1712_v45 }
 0xdec   :  { %968 = vrot.lane.b32.xlu1 %v966_v50, %s1559_s1 }
 0xdf1   :  { %v944_v39 = vpop.f32.mrf.mxu1 }
 0xdfc   :  { %v923_v4 = vpop.f32.mrf.mxu0 }
 0xdfd   :  { %v924_v56 = vadd.f32 %v1721_v51, %v923_v4 }
 0xdff   :  { %v946_v59 = vadd.f32 %v942_v33, %v924_v56 }
 0xe01   :  { %v1403_v61 = vmul.f32 -1.442695, %v946_v59 }
 0xe02   :  { %v998_v34 = vpop.f32.mrf.mxu2 }
 0xe03   :  { %v1022_v52 = vadd.f32 %v998_v34, %v1653_v7  ;;  %v1002_v60 = vadd.f32 %v998_v34, %v137_v57  ;;  %1501 = vpow2.f32 %v1403_v61 }
 0xe04   :  { %v925_v54 = vpop.f32.mrf.mxu0 }
 0xe05   :  { %1024 = vrot.lane.b32.xlu2 %v1022_v52, %s1559_s1  ;;  %v1405_v62 = vmul.f32 -1.442695, %v1002_v60 }
 0xe07   :  { %1503 = vpow2.f32 %v1405_v62 }
 0xe09   :  { %v1502_v63 = vpop.eup %1501 }
 0xe0a   :  { %v1000_v55 = vpop.f32.mrf.mxu2  ;;  %v950_v3 = vadd.f32 1.0, %v1502_v63 }
 0xe0c   :  { %1505 = vrcp.f32 %v950_v3  ;;  %v962_v13 = vand.u32 2147483648, %v950_v3  ;;  %vm956_vm4 = vweird.f32 %v950_v3  ;;  %v960_v16 = vand.u32 2147483647, %v950_v3 }
 0xe0d   :  { %v1504_v2 = vpop.eup %1503 }
 0xe0e   :  { %v1006_v5 = vadd.f32 1.0, %v1504_v2  ;;  %v963_v19 = vor.u32 1.1754944e-38, %v962_v13  ;;  %vm961_vm9 = vcmp.eq.f32.partialorder %v960_v16, 8.507059e+37  ;;  %v1924_v2 = vld [vmem:[%s2024_s7] ss:$0 sm:$0xff]  ;;  %s1562_s7 = smov 32  }
 0xe10   :  { %1507 = vrcp.f32 %v1006_v5  ;;  %v1018_v17 = vand.u32 2147483648, %v1006_v5  ;;  %vm1012_vm7 = vweird.f32 %v1006_v5  ;;  %v1016_v18 = vand.u32 2147483647, %v1006_v5 }
 0xe12   :  { %v1506_v51 = vpop.eup %1505  ;;  %v1019_v21 = vor.u32 1.1754944e-38, %v1018_v17  ;;  %vm1017_vm10 = vcmp.eq.f32.partialorder %v1016_v18, 8.507059e+37 }
 0xe13   :  { %v952_v24 = vmul.f32 %v1506_v51, %v950_v3  ;;  %vm957_vm2 = vweird.f32 %v1506_v51 }
 0xe14   :  { %vm958_vm5 = vmor %vm956_vm4, %vm957_vm2 }
 0xe15   :  { %v953_v6 = vsub.f32 1.0, %v952_v24 }
 0xe16   :  { %v1508_v11 = vpop.eup %1507 }
 0xe17   :  { %v1008_v53 = vmul.f32 %v1508_v11, %v1006_v5  ;;  %v954_v10 = vmul.f32 %v1506_v51, %v953_v6  ;;  %vm1013_vm3 = vweird.f32 %v1508_v11  ;;  %v139_v5 = vadd.f32 %v1894_v41, %v1829_v26 }
 0xe18   :  { %vm1014_vm8 = vmor %vm1012_vm7, %vm1013_vm3 }
 0xe19   :  { %v1009_v9 = vsub.f32 1.0, %v1008_v53  ;;  %v955_v12 = vadd.f32 %v1506_v51, %v954_v10 }
 0xe1b   :  { %v1010_v25 = vmul.f32 %v1508_v11, %v1009_v9  ;;  %v959_v1 = vsel %vm958_vm5, %v1506_v51, %v955_v12 }
 0xe1c   :  { %v964_v23 = vsel %vm961_vm9, %v963_v19, %v959_v1  ;;  %vm1286_vm9 = vcmask 785408  }
 0xe1d   :  { %v1011_v14 = vadd.f32 %v1508_v11, %v1010_v25  ;;  %v978_v44 = vsub.f32 1.0, %v964_v23  ;;  %v984_v36 = vmul.f32 %v964_v23, %v1872_v42 }
 0xe1f   :  { %v1015_v20 = vsel %vm1014_vm8, %v1508_v11, %v1011_v14  ;;  %vm1268_vm8 = vcmask 523264  }
 0xe20   :  { %v1020_v30 = vsel %vm1017_vm10, %v1019_v21, %v1015_v20 }
 0xe21   :  { %v1034_v33 = vsub.f32 1.0, %v1020_v30  ;;  %v1040_v39 = vmul.f32 %v1020_v30, %v1878_v47 }
 0xe5e   :  { %v969_v22 = vpop.permute.xlu1 %968 }
 0xe5f   :  { %v971_v27 = vmul.f32 %v969_v22, %v964_v23  ;;  %v1025_v28 = vpop.permute.xlu2 %1024 }
 0xe60   :  { %v1027_v31 = vmul.f32 %v1025_v28, %v1020_v30 }
 0xe61   :  { %973 = vrot.lane.b32.xlu0 %v971_v27, %s1559_s1 }
 0xe62   :  { %1029 = vrot.lane.b32.xlu1 %v1027_v31, %s1559_s1 }
 0xed3   :  { %v974_v32 = vpop.permute.xlu0 %973 }
 0xed4   :  { %v976_v37 = vadd.f32 %v974_v32, %v924_v56  ;;  %v1030_v38 = vpop.permute.xlu1 %1029 }
 0xed5   :  { %v1032_v40 = vadd.f32 %v1030_v38, %v137_v57 }
 0xed6   :  { %1509 = vtanh.f32 %v976_v37 }
 0xed7   :  { %1511 = vtanh.f32 %v1032_v40 }
 0xedc   :  { %v1510_v43 = vpop.eup %1509 }
 0xedd   :  { %v1512_v15 = vpop.eup %1511  ;;  %980 = vrot.lane.b32.xlu2 %v1510_v43, %s1561_s27 }
 0xede   :  { %1036 = vrot.lane.b32.xlu0 %v1512_v15, %s1561_s27 }
 0xf37   :  { %v981_v35 = vpop.permute.xlu2 %980 }
 0xf38   :  { %v983_v48 = vmul.f32 %v981_v35, %v978_v44 }
 0xf3a   :  { %v1903_v49 = vadd.f32 %v984_v36, %v983_v48 }
 0xf3c   :  { %v986_v0 = vpack.c.bf16 %v1903_v49, %v1903_v49 }
 0xf3e   :  { %1063 = vrot.lane.b32.xlu1 %v986_v0, %s1561_s27 }
 0xf50   :  { %v1037_v50 = vpop.permute.xlu0 %1036 }
 0xf51   :  { %v1039_v4 = vmul.f32 %v1037_v50, %v1034_v33 }
 0xf53   :  { %v1909_v34 = vadd.f32 %v1040_v39, %v1039_v4 }
 0xf55   :  { %v1042_v52 = vpack.c.bf16 %v1909_v34, %v1909_v34 }
 0xf57   :  { %1044 = vrot.lane.b32.xlu2 %v1042_v52, %s1561_s27 }
 0xfb0   :  { %v1064_v54 = vpop.permute.xlu1 %1063 }
 0xfb1   :  { %1407 = vmatmul.msk.bf16.vlgmr.msrb.gmra.mxu0 %vm153_vm6, %v1064_v54  ;;  %v1045_v55 = vpop.permute.xlu2 %1044 }
 0xfb2   :  { %1406 = vmatmul.msk.bf16.vlgmr.msrb.gmra.mxu3 %vm153_vm6, %v1045_v55  ;;  %1409 = vmatmul.msk.bf16.vlgmr.msra.gmra.mxu1 %vm153_vm6, %v1045_v55 }
0x102e   :  { %v1077_v56 = vpop.f32.mrf.mxu0 }
0x102f   :  { %v1101_v57 = vadd.f32 %v1077_v56, %v1712_v45  ;;  %v1133_v47 = vpop.f32.mrf.mxu1 }
0x1030   :  { %v1157_v59 = vadd.f32 %v1133_v47, %v1653_v7  ;;  %v1137_v7 = vadd.f32 %v1133_v47, %v139_v5 }
0x1031   :  { %1103 = vrot.lane.b32.xlu0 %v1101_v57, %s1559_s1 }
0x1032   :  { %1159 = vrot.lane.b32.xlu1 %v1157_v59, %s1559_s1  ;;  %v1410_v24 = vmul.f32 -1.442695, %v1137_v7 }
0x1035   :  { %v1058_v60 = vpop.f32.mrf.mxu3 }
0x1036   :  { %v1079_v61 = vpop.f32.mrf.mxu0  ;;  %v1059_v3 = vadd.f32 %v1924_v2, %v1058_v60 }
0x1037   :  { %v1135_v62 = vpop.f32.mrf.mxu1 }
0x1038   :  { %v1081_v51 = vadd.f32 %v1077_v56, %v1059_v3 }
0x103a   :  { %v1408_v11 = vmul.f32 -1.442695, %v1081_v51 }
0x103c   :  { %1513 = vpow2.f32 %v1408_v11 }
0x103d   :  { %v1060_v63 = vpop.f32.mrf.mxu3  ;;  %1515 = vpow2.f32 %v1410_v24 }
0x1042   :  { %v1514_v53 = vpop.eup %1513 }
0x1043   :  { %v1516_v6 = vpop.eup %1515  ;;  %v1085_v9 = vadd.f32 1.0, %v1514_v53 }
0x1044   :  { %v1141_v10 = vadd.f32 1.0, %v1516_v6 }
0x1045   :  { %1517 = vrcp.f32 %v1085_v9  ;;  %v1097_v1 = vand.u32 2147483648, %v1085_v9  ;;  %vm1091_vm13 = vweird.f32 %v1085_v9  ;;  %v1095_v20 = vand.u32 2147483647, %v1085_v9 }
0x1046   :  { %1519 = vrcp.f32 %v1141_v10  ;;  %v1153_v21 = vand.u32 2147483648, %v1141_v10  ;;  %vm1147_vm15 = vweird.f32 %v1141_v10  ;;  %v1151_v22 = vand.u32 2147483647, %v1141_v10 }
0x1047   :  { %v1098_v27 = vor.u32 1.1754944e-38, %v1097_v1  ;;  %vm1096_vm1 = vcmp.eq.f32.partialorder %v1095_v20, 8.507059e+37  ;;  %v447_v20 = vmax.f32 %v1729_v46, %v1764_v58 }
0x1048   :  { %v1154_v30 = vor.u32 1.1754944e-38, %v1153_v21  ;;  %vm1152_vm2 = vcmp.eq.f32.partialorder %v1151_v22, 8.507059e+37 }
0x1049   :  { %v582_v21 = vmax.f32 %v447_v20, %v1795_v8 }
0x104b   :  { %v1518_v25 = vpop.eup %1517  ;;  %v717_v22 = vmax.f32 %v582_v21, %v1840_v29 }
0x104c   :  { %v1520_v12 = vpop.eup %1519  ;;  %v1087_v13 = vmul.f32 %v1518_v25, %v1085_v9  ;;  %vm1092_vm11 = vweird.f32 %v1518_v25 }
0x104d   :  { %v1143_v14 = vmul.f32 %v1520_v12, %v1141_v10  ;;  %vm1148_vm12 = vweird.f32 %v1520_v12  ;;  %vm1093_vm14 = vmor %vm1091_vm13, %vm1092_vm11 }
0x104e   :  { %v1088_v16 = vsub.f32 1.0, %v1087_v13  ;;  %vm1149_vm0 = vmor %vm1147_vm15, %vm1148_vm12 }
0x104f   :  { %v1144_v17 = vsub.f32 1.0, %v1143_v14 }
0x1050   :  { %v1089_v18 = vmul.f32 %v1518_v25, %v1088_v16 }
0x1051   :  { %v1145_v26 = vmul.f32 %v1520_v12, %v1144_v17 }
0x1052   :  { %v1090_v41 = vadd.f32 %v1518_v25, %v1089_v18 }
0x1053   :  { %v1146_v19 = vadd.f32 %v1520_v12, %v1145_v26 }
0x1054   :  { %v1094_v23 = vsel %vm1093_vm14, %v1518_v25, %v1090_v41 }
0x1055   :  { %v1150_v28 = vsel %vm1149_vm0, %v1520_v12, %v1146_v19  ;;  %v1099_v31 = vsel %vm1096_vm1, %v1098_v27, %v1094_v23  ;;  %v852_v27 = vmax.f32 %v717_v22, %v1872_v42 }
0x1056   :  { %v1155_v40 = vsel %vm1152_vm2, %v1154_v30, %v1150_v28  ;;  %v1113_v33 = vsub.f32 1.0, %v1099_v31  ;;  %v1119_v4 = vmul.f32 %v1099_v31, %v1903_v49 }
0x1057   :  { %v1169_v39 = vsub.f32 1.0, %v1155_v40  ;;  %v1175_v55 = vmul.f32 %v1155_v40, %v1909_v34 }
0x10a3   :  { %v1104_v32 = vpop.permute.xlu0 %1103 }
0x10a4   :  { %v1106_v37 = vmul.f32 %v1104_v32, %v1099_v31  ;;  %v1160_v38 = vpop.permute.xlu1 %1159  ;;  %v987_v32 = vmax.f32 %v852_v27, %v1903_v49 }
0x10a5   :  { %v1162_v43 = vmul.f32 %v1160_v38, %v1155_v40 }
0x10a6   :  { %1108 = vrot.lane.b32.xlu2 %v1106_v37, %s1559_s1 }
0x10a7   :  { %1164 = vrot.lane.b32.xlu0 %v1162_v43, %s1559_s1  ;;  %v1281_v43 = vld [vmem:[%s2026_s9 + $0x58] sm:$0xff] }
0x10a8   :  { %1294 = vmatpush.msra.mxu0 %v1281_v43 }
0x1100   :  { %v1109_v15 = vpop.permute.xlu2 %1108 }
0x1101   :  { %v1111_v44 = vadd.f32 %v1109_v15, %v1059_v3  ;;  %v1280_v15 = vld [vmem:[%s2026_s9 + $0x50] sm:$0xff] }
0x1102   :  { %1295 = vmatpush.msra.mxu0 %v1280_v15 }
0x1103   :  { %1521 = vtanh.f32 %v1111_v44  ;;  %v1279_v44 = vld [vmem:[%s2026_s9 + $0x48] sm:$0xff] }
0x1104   :  { %1296 = vmatpush.msra.mxu0 %v1279_v44 }
0x1109   :  { %v1522_v35 = vpop.eup %1521 }
0x110a   :  { %1115 = vrot.lane.b32.xlu1 %v1522_v35, %s1561_s27  ;;  %v1278_v35 = vld [vmem:[%s2026_s9 + $0x40] sm:$0xff] }
0x110b   :  { %1297 = vmatpush.msra.mxu0 %v1278_v35 }
0x1119   :  { %v1165_v36 = vpop.permute.xlu0 %1164 }
0x111a   :  { %v1167_v48 = vadd.f32 %v1165_v36, %v139_v5  ;;  %v1277_v36 = vld [vmem:[%s2026_s9 + $0x38] sm:$0xff] }
0x111b   :  { %1298 = vmatpush.msra.mxu0 %v1277_v36 }
0x111c   :  { %1523 = vtanh.f32 %v1167_v48  ;;  %v1276_v48 = vld [vmem:[%s2026_s9 + $0x30] sm:$0xff] }
0x111d   :  { %1299 = vmatpush.msra.mxu0 %v1276_v48 }
0x1122   :  { %v1524_v0 = vpop.eup %1523 }
0x1123   :  { %1171 = vrot.lane.b32.xlu2 %v1524_v0, %s1561_s27  ;;  %v1275_v0 = vld [vmem:[%s2026_s9 + $0x28] sm:$0xff] }
0x1124   :  { %1300 = vmatpush.msra.mxu0 %v1275_v0 }
0x117c   :  { %v1116_v50 = vpop.permute.xlu1 %1115 }
0x117d   :  { %v1118_v52 = vmul.f32 %v1116_v50, %v1113_v33  ;;  %v1172_v54 = vpop.permute.xlu2 %1171  ;;  %v1274_v33 = vld [vmem:[%s2026_s9 + $0x20] sm:$0xff]  ;;  %v1273_v50 = vld [vmem:[%s2026_s9 + $0x18] sm:$0xff] }
0x117e   :  { %v1174_v56 = vmul.f32 %v1172_v54, %v1169_v39  ;;  %1301 = vmatpush.msra.mxu0 %v1274_v33  ;;  %v1272_v39 = vld [vmem:[%s2026_s9 + $0x10] sm:$0xff]  ;;  %v448_v54 = vadd.f32 %v1764_v58, %v1729_v46  ;;  %v1434_v58 = vld [vmem:[%s2027_s10] ss:$0 sm:$0xff] }
0x117f   :  { %v1935_v57 = vadd.f32 %v1119_v4, %v1118_v52  ;;  %v1271_v4 = vld [vmem:[%s2026_s9 + $0x8] sm:$0xff]  ;;  %v1270_v52 = vld [vmem:[%s2026_s9] sm:$0xff] }
0x1180   :  { %v1937_v47 = vadd.f32 %v1175_v55, %v1174_v56  ;;  %1302 = vmatpush.msra.mxu0 %v1273_v50  ;;  %v583_v55 = vadd.f32 %v1795_v8, %v448_v54 }
0x1181   :  { %v1121_v59 = vpack.c.bf16 %v1935_v57, %v1935_v57  ;;  %v1122_v38 = vmax.f32 %v987_v32, %v1935_v57 }
0x1182   :  { %v1177_v60 = vpack.c.bf16 %v1937_v47, %v1937_v47  ;;  %1303 = vmatpush.msra.mxu0 %v1272_v39  ;;  %v718_v56 = vadd.f32 %v1840_v29, %v583_v55 }
0x1183   :  { %1198 = vrot.lane.b32.xlu0 %v1121_v59, %s1561_s27 }
0x1184   :  { %1179 = vrot.lane.b32.xlu1 %v1177_v60, %s1561_s27  ;;  %1304 = vmatpush.msra.mxu0 %v1271_v4  ;;  %v853_v59 = vadd.f32 %v1872_v42, %v718_v56 }
0x1186   :  { %1305 = vmatpush.msra.mxu0 %v1270_v52  ;;  %v988_v60 = vadd.f32 %v1903_v49, %v853_v59 }
0x11f5   :  { %v1199_v61 = vpop.permute.xlu0 %1198 }
0x11f6   :  { %v1180_v62 = vpop.permute.xlu1 %1179  ;;  %1412 = vmatmul.msk.bf16.vlgmr.msra.gmra.mxu3 %vm153_vm6, %v1199_v61  ;;  %v1123_v61 = vadd.f32 %v1935_v57, %v988_v60 }
0x11f7   :  { %1411 = vmatmul.msk.bf16.vlgmr.msra.gmra.mxu2 %vm153_vm6, %v1180_v62 }
0x1279   :  { %v1212_v34 = vpop.f32.mrf.mxu3 }
0x127a   :  { %v1236_v63 = vadd.f32 %v1212_v34, %v1712_v45  ;;  %v1193_v3 = vpop.f32.mrf.mxu2 }
0x127b   :  { %v1194_v7 = vadd.f32 %v1924_v2, %v1193_v3 }
0x127c   :  { %1238 = vrot.lane.b32.xlu2 %v1236_v63, %s1559_s1 }
0x127d   :  { %v1216_v11 = vadd.f32 %v1212_v34, %v1194_v7 }
0x127f   :  { %v1413_v24 = vmul.f32 -1.442695, %v1216_v11 }
0x1281   :  { %v1214_v5 = vpop.f32.mrf.mxu3  ;;  %1525 = vpow2.f32 %v1413_v24 }
0x1282   :  { %v1195_v51 = vpop.f32.mrf.mxu2 }
0x1287   :  { %v1526_v53 = vpop.eup %1525 }
0x1288   :  { %v1220_v6 = vadd.f32 1.0, %v1526_v53 }
0x128a   :  { %1527 = vrcp.f32 %v1220_v6  ;;  %v1232_v45 = vand.u32 2147483648, %v1220_v6  ;;  %vm1226_vm4 = vweird.f32 %v1220_v6  ;;  %v1230_v14 = vand.u32 2147483647, %v1220_v6 }
0x128c   :  { %v1233_v17 = vor.u32 1.1754944e-38, %v1232_v45  ;;  %vm1231_vm7 = vcmp.eq.f32.partialorder %v1230_v14, 8.507059e+37 }
0x1290   :  { %v1528_v9 = vpop.eup %1527 }
0x1291   :  { %v1222_v10 = vmul.f32 %v1528_v9, %v1220_v6  ;;  %vm1227_vm3 = vweird.f32 %v1528_v9 }
0x1292   :  { %vm1228_vm5 = vmor %vm1226_vm4, %vm1227_vm3 }
0x1293   :  { %v1223_v25 = vsub.f32 1.0, %v1222_v10 }
0x1295   :  { %v1224_v12 = vmul.f32 %v1528_v9, %v1223_v25 }
0x1297   :  { %v1225_v13 = vadd.f32 %v1528_v9, %v1224_v12 }
0x1299   :  { %v1229_v16 = vsel %vm1228_vm5, %v1528_v9, %v1225_v13 }
0x129a   :  { %v1234_v18 = vsel %vm1231_vm7, %v1233_v17, %v1229_v16 }
0x129b   :  { %v1248_v23 = vsub.f32 1.0, %v1234_v18  ;;  %v1254_v30 = vmul.f32 %v1234_v18, %v1935_v57 }
0x12d6   :  { %v1239_v2 = vpop.permute.xlu2 %1238 }
0x12d7   :  { %v1241_v26 = vmul.f32 %v1239_v2, %v1234_v18 }
0x12d9   :  { %1243 = vrot.lane.b32.xlu0 %v1241_v26, %s1559_s1  ;;  %s1323_s1 = sshll.u32 %s2028_s11, 4  ;;  %s1324_s1 = int_to_ptr.hbm [resolvable:$true] %s1323_s1 }
0x134b   :  { %v1244_v41 = vpop.permute.xlu0 %1243 }
0x134c   :  { %v1246_v1 = vadd.f32 %v1244_v41, %v1194_v7 }
0x134e   :  { %1529 = vtanh.f32 %v1246_v1 }
0x1354   :  { %v1530_v19 = vpop.eup %1529 }
0x1355   :  { %1250 = vrot.lane.b32.xlu1 %v1530_v19, %s1561_s27 }
0x13c7   :  { %v1251_v28 = vpop.permute.xlu1 %1250 }
0x13c8   :  { %v1253_v31 = vmul.f32 %v1251_v28, %v1248_v23 }
0x13ca   :  { %v1255_v37 = vadd.f32 %v1254_v30, %v1253_v31 }
0x13cc   :  { %1264 = vrot.lane.b32.xlu0 %v1255_v37, %s1562_s7  ;;  %v1256_v40 = vmax.f32 %v1122_v38, %v1255_v37  ;;  %v1257_v62 = vadd.f32 %v1255_v37, %v1123_v61 }
0x13ce   :  { %1260 = vrot.lane.b32.xlu2 %v1256_v40, %s1561_s27  ;;  %v1258_v63 = vmul.f32 0.125, %v1257_v62 }
0x1428   :  { %v1261_v34 = vpop.permute.xlu2 %1260 }
0x1429   :  { %v1267_v3 = vsel %vm153_vm6, %v1261_v34, %v1258_v63 }
0x143e   :  { %v1265_v5 = vpop.permute.xlu0 %1264 }
0x143f   :  { %v1269_v46 = vsel %vm1268_vm8, %v1267_v3, %v1265_v5 }
0x1440   :  { %1414 = vmatmul.msk.f32.vlgmr.msra.gmra.mxu0 %vm1286_vm9, %v1269_v46 }
0x14bd   :  { %v1307_v8 = vpop.f32.mrf.mxu0 }
0x14be   :  { %v1308_v29 = vadd.f32 %v1434_v58, %v1307_v8 }
0x14c0   :  { %vm1310_vm10 = vcmp.ge.f32.partialorder %v1308_v29, 0.0  ;;  %v1311_v42 = vmul.f32 0.2, %v1308_v29 }
0x14c2   :  { %v1312_v49 = vsel %vm1310_vm10, %v1308_v29, %v1311_v42 }
0x14c3   :  { %v1313_v57 = vsel %vm153_vm6, %v1312_v49, %v1937_v47 }
0x14c4   :  { %v1314_v51 = vsel %vm1268_vm8, %v1313_v57, %v1265_v5 }
0x14c5   :  { %1315 = vst.msk [vmem:[#allocation2] sm:$0xff] %vm1286_vm9, %v1314_v51 }
0x14c6   :  { %1326 = dma.vmem_to_hbm [thread:$0]  %s1322_s25, 128, %s1324_s1, [#allocation3]  }
0x14c7   :  { %1557 = dma.done.wait [#allocation3], 128  }
0x14c8   :  { %1558 = vsyncadd [#allocation3], 4294967168 }
0x14c9   :  { %1331 = vsyncpa [#allocation3], 1 }

</bundles_post_ra>
